<compile_context>
chip_gen: v7x
topology: tpu7x:2x2x1
jax: 0.10.0
libtpu: 0.0.40
codegen_flags: <defaults>
</compile_context>

<pallas_src>
import functools
import math

import jax
import jax.numpy as jnp
from jax import lax
from jax.experimental import pallas as pl
from jax.experimental.pallas import tpu as pltpu

# ---- model configuration (small, consistent with the module's __init__) ----
HIDDEN = 32          # hidden_size == input_size
N_HEAD = 2
N_LAYER = 2
HEAD_DIM = HIDDEN // N_HEAD
MAX_SEQ_LEN = 8      # max_seq_length
B = 2                # batch
T = MAX_SEQ_LEN      # training path: full sequence
LN_EPS = 1e-5        # GPT2 layer_norm_epsilon default
LANE = 128           # TPU lane width
MASK_NEG = -1e30     # large finite negative (no -inf/NaN hazard)


def _layer_norm(x, g, b):
    # x: (N, H), g/b: (1, H)
    mean = jnp.mean(x, axis=-1, keepdims=True)
    var = jnp.mean(jnp.square(x - mean), axis=-1, keepdims=True)
    return (x - mean) * lax.rsqrt(var + LN_EPS) * g + b


def _gelu_new(x):
    # GPT2 "gelu_new" (tanh approximation); tanh routes to the EUP.
    return 0.5 * x * (1.0 + jnp.tanh(
        math.sqrt(2.0 / math.pi) * (x + 0.044715 * x * x * x)))


def _pack_lanes(x):
    """(N, H) -> (N//g, g*H) lane-dense packing with g = LANE // H.

    Row i of the result is [x_i, x_{i+N//g}, ..., x_{i+(g-1)*N//g}]
    (built with lane-axis concatenation, which always lowers)."""
    n, h = x.shape
    g = LANE // h
    rg = n // g
    return jnp.concatenate([x[j * rg:(j + 1) * rg, :] for j in range(g)], axis=1)


def _unpack_lanes(p, n, h):
    """Wrapper-side inverse of _pack_lanes (plain XLA ops)."""
    g = LANE // h
    rg = n // g
    return p.reshape(rg, g, h).transpose(1, 0, 2).reshape(n, h)


def gpt2_kernel(x_ref, pos_ref, vec_ref,
                attn_slab_ref, fc_w_ref, mlp_pw_ref,
                out_ref, kv_ref, *, n_batch, seq_len):
    """Whole GPT2 stack in one kernel (everything fits in VMEM at these sizes)."""
    n_tok = x_ref.shape[0]
    pack_rows = n_tok // (LANE // HIDDEN)
    h = x_ref[...] + pos_ref[...]                       # (N, H)

    # Block-diagonal causal mask as an additive bias, built in-kernel
    # (comparisons only: no DMA'd mask array, no int div/mod on the VPU).
    i_idx = lax.broadcasted_iota(jnp.int32, (n_tok, n_tok), 0)
    j_idx = lax.broadcasted_iota(jnp.int32, (n_tok, n_tok), 1)
    same_batch = None
    for b in range(n_batch):
        lo, hi = b * seq_len, (b + 1) * seq_len
        blk = ((i_idx >= lo) & (i_idx < hi)) & ((j_idx >= lo) & (j_idx < hi))
        same_batch = blk if same_batch is None else (same_batch | blk)
    allowed = same_batch & (j_idx <= i_idx)
    mask_bias = jnp.where(allowed, 0.0, MASK_NEG)       # (N, N)

    scale = 1.0 / math.sqrt(HEAD_DIM)

    for l in range(N_LAYER):
        vec = vec_ref[l]                                # (8, 128) packed params
        ln1_g, ln1_b = vec[0:1, 0:HIDDEN], vec[1:2, 0:HIDDEN]
        ln2_g, ln2_b = vec[2:3, 0:HIDDEN], vec[3:4, 0:HIDDEN]
        attn_pb, mlp_pb = vec[4:5, 0:HIDDEN], vec[5:6, 0:HIDDEN]
        attn_b = vec[6:7, 0:3 * HIDDEN]
        fc_b = vec[7:8, 0:4 * HIDDEN]

        attn_slab = attn_slab_ref[l]                    # (H, 128) lane-dense
        attn_w_l = attn_slab[:, 0:3 * HIDDEN]           # (H, 3H)
        attn_pw_l = attn_slab[:, 3 * HIDDEN:4 * HIDDEN] # (H, H)

        # ----------------- attention block -----------------
        a_in = _layer_norm(h, ln1_g, ln1_b)
        qkv = jnp.dot(a_in, attn_w_l,
                      preferred_element_type=jnp.float32) + attn_b     # (N, 3H)
        q = qkv[:, 0:HIDDEN] * scale           # fold 1/sqrt(head_dim) into q
        k = qkv[:, HIDDEN:2 * HIDDEN]
        v = qkv[:, 2 * HIDDEN:3 * HIDDEN]

        # per-layer key/value cache payload (HF past_key_values): lane-dense
        # slabs stored directly with static sublane slices (no trailing concat).
        base = 2 * l * pack_rows
        kv_ref[base:base + pack_rows, :] = _pack_lanes(k)
        kv_ref[base + pack_rows:base + 2 * pack_rows, :] = _pack_lanes(v)

        ctx_heads = []
        for hd in range(N_HEAD):
            s = hd * HEAD_DIM
            # q_h @ k_h^T via dot_general contracting last dims (no XLU vxpose).
            scores = lax.dot_general(
                q[:, s:s + HEAD_DIM], k[:, s:s + HEAD_DIM],
                dimension_numbers=(((1,), (1,)), ((), ())),
                preferred_element_type=jnp.float32) + mask_bias
            scores = scores - jnp.max(scores, axis=-1, keepdims=True)
            p = jnp.exp(scores)
            p = p * pl.reciprocal(jnp.sum(p, axis=-1, keepdims=True), approx=True)
            ctx_heads.append(jnp.dot(p, v[:, s:s + HEAD_DIM],
                                     preferred_element_type=jnp.float32))
        ctx = jnp.concatenate(ctx_heads, axis=1)         # (N, H)
        h = h + jnp.dot(ctx, attn_pw_l,
                        preferred_element_type=jnp.float32) + attn_pb

        # -------------------- MLP block ---------------------
        m_in = _layer_norm(h, ln2_g, ln2_b)
        ff = _gelu_new(jnp.dot(m_in, fc_w_ref[l],
                               preferred_element_type=jnp.float32) + fc_b)
        h = h + jnp.dot(ff, mlp_pw_ref[l],
                        preferred_element_type=jnp.float32) + mlp_pb

    lnf = vec_ref[N_LAYER]
    out = _layer_norm(h, lnf[0:1, 0:HIDDEN], lnf[1:2, 0:HIDDEN])

    # lane-dense store (full-width 128-lane vst, no masked partial stores)
    out_ref[...] = _pack_lanes(out)


def init_params(key):
    """Deterministic synthetic parameters matching GPT2Model / Embedding shapes."""
    ks = jax.random.split(key, 6)
    std = 0.02
    p = {}
    # LearnedPositionalEncoding: nn.Embedding(max_seq_length + 2, hidden) ~ N(0, 1)
    p['embed_timestep'] = jax.random.normal(ks[0], (MAX_SEQ_LEN + 2, HIDDEN), jnp.float32)
    # GPT2 internal position embeddings (wpe) ~ N(0, 0.02)
    p['wpe'] = std * jax.random.normal(ks[1], (MAX_SEQ_LEN + 2, HIDDEN), jnp.float32)
    p['ln1_g'] = jnp.ones((N_LAYER, HIDDEN), jnp.float32)
    p['ln1_b'] = jnp.zeros((N_LAYER, HIDDEN), jnp.float32)
    p['attn_w'] = std * jax.random.normal(ks[2], (N_LAYER, HIDDEN, 3 * HIDDEN), jnp.float32)
    p['attn_b'] = jnp.zeros((N_LAYER, 3 * HIDDEN), jnp.float32)
    p['attn_pw'] = std * jax.random.normal(ks[3], (N_LAYER, HIDDEN, HIDDEN), jnp.float32)
    p['attn_pb'] = jnp.zeros((N_LAYER, HIDDEN), jnp.float32)
    p['ln2_g'] = jnp.ones((N_LAYER, HIDDEN), jnp.float32)
    p['ln2_b'] = jnp.zeros((N_LAYER, HIDDEN), jnp.float32)
    p['fc_w'] = std * jax.random.normal(ks[4], (N_LAYER, HIDDEN, 4 * HIDDEN), jnp.float32)
    p['fc_b'] = jnp.zeros((N_LAYER, 4 * HIDDEN), jnp.float32)
    p['mlp_pw'] = std * jax.random.normal(ks[5], (N_LAYER, 4 * HIDDEN, HIDDEN), jnp.float32)
    p['mlp_pb'] = jnp.zeros((N_LAYER, HIDDEN), jnp.float32)
    p['lnf_g'] = jnp.ones((HIDDEN,), jnp.float32)
    p['lnf_b'] = jnp.zeros((HIDDEN,), jnp.float32)
    return p


def _pack_vec_params(p):
    """Pack all small per-layer vectors into one lane-dense (L+1, 8, 128) array."""
    vec = jnp.zeros((N_LAYER + 1, 8, LANE), jnp.float32)
    vec = vec.at[:N_LAYER, 0, :HIDDEN].set(p['ln1_g'])
    vec = vec.at[:N_LAYER, 1, :HIDDEN].set(p['ln1_b'])
    vec = vec.at[:N_LAYER, 2, :HIDDEN].set(p['ln2_g'])
    vec = vec.at[:N_LAYER, 3, :HIDDEN].set(p['ln2_b'])
    vec = vec.at[:N_LAYER, 4, :HIDDEN].set(p['attn_pb'])
    vec = vec.at[:N_LAYER, 5, :HIDDEN].set(p['mlp_pb'])
    vec = vec.at[:N_LAYER, 6, :3 * HIDDEN].set(p['attn_b'])
    vec = vec.at[:N_LAYER, 7, :4 * HIDDEN].set(p['fc_b'])
    vec = vec.at[N_LAYER, 0, :HIDDEN].set(p['lnf_g'])
    vec = vec.at[N_LAYER, 1, :HIDDEN].set(p['lnf_b'])
    return vec


def gpt2_forward(params, input_embeds):
    """Equivalent of GPT2.forward(input_embeds, h_0=None).

    input_embeds: (T, B, H) float32  (PyTorch training layout)
    returns (output (T, B, H), h = (past_key_values, None, None))
    """
    # TODO(synk): the h_0 != None incremental-decoding branch (past_key_values
    # reuse / history truncation) is not implemented; only the training path is.
    T_, B_, H = input_embeds.shape
    assert H == HIDDEN and LANE % H == 0
    n_tok = B_ * T_
    pack_g = LANE // H
    assert n_tok % pack_g == 0
    pack_rows = n_tok // pack_g

    timesteps = jnp.arange(T_)
    # learned timestep embedding + GPT2's own wpe position embedding
    pos = params['embed_timestep'][timesteps] + params['wpe'][timesteps]   # (T, H)

    x = jnp.swapaxes(input_embeds, 0, 1).reshape(n_tok, H)                 # (N, H)
    pos_flat = jnp.tile(pos, (B_, 1))                                      # (N, H)
    vec = _pack_vec_params(params)
    # lane-dense packing of attn qkv weight (96 lanes) + attn proj weight
    # (32 lanes) into one (L, H, 128) slab -> one input, full-width DMA tiles.
    attn_slab = jnp.concatenate([params['attn_w'], params['attn_pw']], axis=2)

    kernel = functools.partial(gpt2_kernel, n_batch=B_, seq_len=T_)
    n_inputs = 6
    out_slab, kv_slab = pl.pallas_call(
        kernel,
        out_shape=(
            jax.ShapeDtypeStruct((pack_rows, LANE), jnp.float32),
            jax.ShapeDtypeStruct((N_LAYER * 2 * pack_rows, LANE), jnp.float32),
        ),
        in_specs=[pl.BlockSpec(memory_space=pltpu.MemorySpace.VMEM)] * n_inputs,
        out_specs=(
            pl.BlockSpec(memory_space=pltpu.MemorySpace.VMEM),
            pl.BlockSpec(memory_space=pltpu.MemorySpace.VMEM),
        ),
    )(x, pos_flat, vec, attn_slab, params['fc_w'], params['mlp_pw'])

    # undo the lane-dense packing (plain XLA ops outside the kernel)
    out_flat = _unpack_lanes(out_slab, n_tok, H)                           # (N, H)
    output = jnp.swapaxes(out_flat.reshape(B_, T_, H), 0, 1)               # (T, B, H)

    kv = kv_slab.reshape(N_LAYER, 2, pack_rows, pack_g, H)
    kv = kv.transpose(0, 1, 3, 2, 4).reshape(N_LAYER, 2, n_tok, H)
    # past_key_values in HF layout: per layer (key, value) of (B, n_head, T, head_dim)
    kv = kv.reshape(N_LAYER, 2, B_, T_, N_HEAD, HEAD_DIM).transpose(0, 1, 2, 4, 3, 5)
    pkv = tuple((kv[l, 0], kv[l, 1]) for l in range(N_LAYER))
    return output, (pkv, None, None)


if __name__ == "__main__":
    key = jax.random.PRNGKey(0)
    pkey, xkey = jax.random.split(key)
    params = init_params(pkey)

    # training-mode input: (max_seq_length, B, input_dim) with input_dim == hidden
    input_embeds = jax.random.normal(xkey, (T, B, HIDDEN), jnp.float32)

    output, h = jax.jit(gpt2_forward)(params, input_embeds)
    jax.block_until_ready(output)
    jax.block_until_ready(h[0])

    assert output.shape == (T, B, HIDDEN)
    assert bool(jnp.all(jnp.isfinite(output)))
    print("KERNEL_OK")
</pallas_src>

<mosaic_0001>
module attributes {stable_mosaic.version = 11 : i64} {
  func.func @gpt2_kernel(%arg0: memref<16x32xf32, #tpu.memory_space<vmem>>, %arg1: memref<16x32xf32, #tpu.memory_space<vmem>>, %arg2: memref<3x8x128xf32, #tpu.memory_space<vmem>>, %arg3: memref<2x32x128xf32, #tpu.memory_space<vmem>>, %arg4: memref<2x32x128xf32, #tpu.memory_space<vmem>>, %arg5: memref<2x128x32xf32, #tpu.memory_space<vmem>>, %arg6: memref<4x128xf32, #tpu.memory_space<vmem>>, %arg7: memref<16x128xf32, #tpu.memory_space<vmem>>) attributes {dimension_semantics = [], scalar_prefetch = 0 : i64, scratch_operands = 0 : i64, tpu.core_type = #tpu.core_type<tc>} {
    %c0 = arith.constant 0 : index
    %c0_0 = arith.constant 0 : index
    %0 = vector.load %arg0[%c0, %c0_0] : memref<16x32xf32, #tpu.memory_space<vmem>>, vector<16x32xf32>
    %c0_1 = arith.constant 0 : index
    %c0_2 = arith.constant 0 : index
    %1 = vector.load %arg1[%c0_1, %c0_2] : memref<16x32xf32, #tpu.memory_space<vmem>>, vector<16x32xf32>
    %2 = arith.addf %0, %1 : vector<16x32xf32>
    %3 = tpu.iota {dimensions = array<i32: 0>} : vector<16x16xi32>
    %4 = tpu.iota {dimensions = array<i32: 1>} : vector<16x16xi32>
    %c0_i32 = arith.constant 0 : i32
    %5 = vector.broadcast %c0_i32 : i32 to vector<16x16xi32>
    %6 = arith.cmpi sge, %3, %5 : vector<16x16xi32>
    %c8_i32 = arith.constant 8 : i32
    %7 = vector.broadcast %c8_i32 : i32 to vector<16x16xi32>
    %8 = arith.cmpi slt, %3, %7 : vector<16x16xi32>
    %9 = arith.andi %6, %8 : vector<16x16xi1>
    %c0_i32_3 = arith.constant 0 : i32
    %10 = vector.broadcast %c0_i32_3 : i32 to vector<16x16xi32>
    %11 = arith.cmpi sge, %4, %10 : vector<16x16xi32>
    %c8_i32_4 = arith.constant 8 : i32
    %12 = vector.broadcast %c8_i32_4 : i32 to vector<16x16xi32>
    %13 = arith.cmpi slt, %4, %12 : vector<16x16xi32>
    %14 = arith.andi %11, %13 : vector<16x16xi1>
    %15 = arith.andi %9, %14 : vector<16x16xi1>
    %c8_i32_5 = arith.constant 8 : i32
    %16 = vector.broadcast %c8_i32_5 : i32 to vector<16x16xi32>
    %17 = arith.cmpi sge, %3, %16 : vector<16x16xi32>
    %c16_i32 = arith.constant 16 : i32
    %18 = vector.broadcast %c16_i32 : i32 to vector<16x16xi32>
    %19 = arith.cmpi slt, %3, %18 : vector<16x16xi32>
    %20 = arith.andi %17, %19 : vector<16x16xi1>
    %c8_i32_6 = arith.constant 8 : i32
    %21 = vector.broadcast %c8_i32_6 : i32 to vector<16x16xi32>
    %22 = arith.cmpi sge, %4, %21 : vector<16x16xi32>
    %c16_i32_7 = arith.constant 16 : i32
    %23 = vector.broadcast %c16_i32_7 : i32 to vector<16x16xi32>
    %24 = arith.cmpi slt, %4, %23 : vector<16x16xi32>
    %25 = arith.andi %22, %24 : vector<16x16xi1>
    %26 = arith.andi %20, %25 : vector<16x16xi1>
    %27 = arith.ori %15, %26 : vector<16x16xi1>
    %28 = arith.cmpi sle, %4, %3 : vector<16x16xi32>
    %29 = arith.andi %27, %28 : vector<16x16xi1>
    %cst = arith.constant 0.000000e+00 : f32
    %cst_8 = arith.constant -1.000000e+30 : f32
    %30 = vector.broadcast %cst : f32 to vector<16x16xf32>
    %31 = vector.broadcast %cst_8 : f32 to vector<16x16xf32>
    %32 = arith.select %29, %30, %31 : vector<16x16xi1>, vector<16x16xf32>
    %c0_9 = arith.constant 0 : index
    %c0_10 = arith.constant 0 : index
    %c0_11 = arith.constant 0 : index
    %33 = vector.load %arg2[%c0_9, %c0_10, %c0_11] : memref<3x8x128xf32, #tpu.memory_space<vmem>>, vector<1x8x128xf32>
    %34 = vector.shape_cast %33 : vector<1x8x128xf32> to vector<8x128xf32>
    %35 = vector.extract_strided_slice %34 {offsets = [0, 0], sizes = [1, 32], strides = [1, 1]} : vector<8x128xf32> to vector<1x32xf32>
    %36 = vector.extract_strided_slice %34 {offsets = [1, 0], sizes = [1, 32], strides = [1, 1]} : vector<8x128xf32> to vector<1x32xf32>
    %37 = vector.extract_strided_slice %34 {offsets = [2, 0], sizes = [1, 32], strides = [1, 1]} : vector<8x128xf32> to vector<1x32xf32>
    %38 = vector.extract_strided_slice %34 {offsets = [3, 0], sizes = [1, 32], strides = [1, 1]} : vector<8x128xf32> to vector<1x32xf32>
    %39 = vector.extract_strided_slice %34 {offsets = [4, 0], sizes = [1, 32], strides = [1, 1]} : vector<8x128xf32> to vector<1x32xf32>
    %40 = vector.extract_strided_slice %34 {offsets = [5, 0], sizes = [1, 32], strides = [1, 1]} : vector<8x128xf32> to vector<1x32xf32>
    %41 = vector.extract_strided_slice %34 {offsets = [6, 0], sizes = [1, 96], strides = [1, 1]} : vector<8x128xf32> to vector<1x96xf32>
    %42 = vector.extract_strided_slice %34 {offsets = [7, 0], sizes = [1, 128], strides = [1, 1]} : vector<8x128xf32> to vector<1x128xf32>
    %c0_12 = arith.constant 0 : index
    %c0_13 = arith.constant 0 : index
    %c0_14 = arith.constant 0 : index
    %43 = vector.load %arg3[%c0_12, %c0_13, %c0_14] : memref<2x32x128xf32, #tpu.memory_space<vmem>>, vector<1x32x128xf32>
    %44 = vector.shape_cast %43 : vector<1x32x128xf32> to vector<32x128xf32>
    %45 = vector.extract_strided_slice %44 {offsets = [0, 0], sizes = [32, 96], strides = [1, 1]} : vector<32x128xf32> to vector<32x96xf32>
    %46 = vector.extract_strided_slice %44 {offsets = [0, 96], sizes = [32, 32], strides = [1, 1]} : vector<32x128xf32> to vector<32x32xf32>
    %cst_15 = arith.constant dense<0.000000e+00> : vector<16xf32>
    %47 = vector.multi_reduction <add>, %2, %cst_15 [1] : vector<16x32xf32> to vector<16xf32>
    %48 = vector.shape_cast %47 : vector<16xf32> to vector<16x1xf32>
    %cst_16 = arith.constant 3.200000e+01 : f32
    %49 = vector.broadcast %cst_16 : f32 to vector<16x1xf32>
    %50 = arith.divf %48, %49 : vector<16x1xf32>
    %51 = vector.broadcast %50 : vector<16x1xf32> to vector<16x32xf32>
    %52 = arith.subf %2, %51 : vector<16x32xf32>
    %53 = arith.mulf %52, %52 : vector<16x32xf32>
    %cst_17 = arith.constant dense<0.000000e+00> : vector<16xf32>
    %54 = vector.multi_reduction <add>, %53, %cst_17 [1] : vector<16x32xf32> to vector<16xf32>
    %55 = vector.shape_cast %54 : vector<16xf32> to vector<16x1xf32>
    %cst_18 = arith.constant 3.200000e+01 : f32
    %56 = vector.broadcast %cst_18 : f32 to vector<16x1xf32>
    %57 = arith.divf %55, %56 : vector<16x1xf32>
    %58 = vector.broadcast %50 : vector<16x1xf32> to vector<16x32xf32>
    %59 = arith.subf %2, %58 : vector<16x32xf32>
    %cst_19 = arith.constant 9.99999974E-6 : f32
    %60 = vector.broadcast %cst_19 : f32 to vector<16x1xf32>
    %61 = arith.addf %57, %60 : vector<16x1xf32>
    %62 = math.rsqrt %61 : vector<16x1xf32>
    %63 = vector.broadcast %62 : vector<16x1xf32> to vector<16x32xf32>
    %64 = arith.mulf %59, %63 : vector<16x32xf32>
    %65 = vector.broadcast %35 : vector<1x32xf32> to vector<16x32xf32>
    %66 = arith.mulf %64, %65 : vector<16x32xf32>
    %67 = vector.broadcast %36 : vector<1x32xf32> to vector<16x32xf32>
    %68 = arith.addf %66, %67 : vector<16x32xf32>
    %cst_20 = arith.constant dense<0.000000e+00> : vector<16x96xf32>
    %69 = tpu.matmul %68, %45, %cst_20 {dimension_numbers = #tpu.dot_dimension_numbers<[1], [0], [0], [1], [0, 0, 1, 1], [], []>} : vector<16x32xf32>, vector<32x96xf32>, vector<16x96xf32> -> vector<16x96xf32>
    %70 = vector.broadcast %41 : vector<1x96xf32> to vector<16x96xf32>
    %71 = arith.addf %69, %70 : vector<16x96xf32>
    %72 = vector.extract_strided_slice %71 {offsets = [0, 0], sizes = [16, 32], strides = [1, 1]} : vector<16x96xf32> to vector<16x32xf32>
    %cst_21 = arith.constant 2.500000e-01 : f32
    %73 = vector.broadcast %cst_21 : f32 to vector<16x32xf32>
    %74 = arith.mulf %72, %73 : vector<16x32xf32>
    %75 = vector.extract_strided_slice %71 {offsets = [0, 32], sizes = [16, 32], strides = [1, 1]} : vector<16x96xf32> to vector<16x32xf32>
    %76 = vector.extract_strided_slice %71 {offsets = [0, 64], sizes = [16, 32], strides = [1, 1]} : vector<16x96xf32> to vector<16x32xf32>
    %77 = vector.extract_strided_slice %75 {offsets = [0, 0], sizes = [4, 32], strides = [1, 1]} : vector<16x32xf32> to vector<4x32xf32>
    %78 = vector.extract_strided_slice %75 {offsets = [4, 0], sizes = [4, 32], strides = [1, 1]} : vector<16x32xf32> to vector<4x32xf32>
    %79 = vector.extract_strided_slice %75 {offsets = [8, 0], sizes = [4, 32], strides = [1, 1]} : vector<16x32xf32> to vector<4x32xf32>
    %80 = vector.extract_strided_slice %75 {offsets = [12, 0], sizes = [4, 32], strides = [1, 1]} : vector<16x32xf32> to vector<4x32xf32>
    %81 = tpu.concatenate %77, %78, %79, %80 in 1 : vector<4x32xf32>, vector<4x32xf32>, vector<4x32xf32>, vector<4x32xf32> -> vector<4x128xf32>
    %c0_22 = arith.constant 0 : index
    %c0_23 = arith.constant 0 : index
    %82 = vector.load %arg7[%c0_22, %c0_23] : memref<16x128xf32, #tpu.memory_space<vmem>>, vector<4x128xf32>
    tpu.vector_store %arg7[%c0_22, %c0_23], %81 {strides = array<i32>} : memref<16x128xf32, #tpu.memory_space<vmem>>, vector<4x128xf32>,
    %83 = vector.extract_strided_slice %76 {offsets = [0, 0], sizes = [4, 32], strides = [1, 1]} : vector<16x32xf32> to vector<4x32xf32>
    %84 = vector.extract_strided_slice %76 {offsets = [4, 0], sizes = [4, 32], strides = [1, 1]} : vector<16x32xf32> to vector<4x32xf32>
    %85 = vector.extract_strided_slice %76 {offsets = [8, 0], sizes = [4, 32], strides = [1, 1]} : vector<16x32xf32> to vector<4x32xf32>
    %86 = vector.extract_strided_slice %76 {offsets = [12, 0], sizes = [4, 32], strides = [1, 1]} : vector<16x32xf32> to vector<4x32xf32>
    %87 = tpu.concatenate %83, %84, %85, %86 in 1 : vector<4x32xf32>, vector<4x32xf32>, vector<4x32xf32>, vector<4x32xf32> -> vector<4x128xf32>
    %c4 = arith.constant 4 : index
    %c0_24 = arith.constant 0 : index
    %88 = vector.load %arg7[%c4, %c0_24] : memref<16x128xf32, #tpu.memory_space<vmem>>, vector<4x128xf32>
    tpu.vector_store %arg7[%c4, %c0_24], %87 {strides = array<i32>} : memref<16x128xf32, #tpu.memory_space<vmem>>, vector<4x128xf32>,
    %89 = vector.extract_strided_slice %74 {offsets = [0, 0], sizes = [16, 16], strides = [1, 1]} : vector<16x32xf32> to vector<16x16xf32>
    %90 = vector.extract_strided_slice %75 {offsets = [0, 0], sizes = [16, 16], strides = [1, 1]} : vector<16x32xf32> to vector<16x16xf32>
    %cst_25 = arith.constant dense<0.000000e+00> : vector<16x16xf32>
    %91 = tpu.matmul %89, %90, %cst_25 {dimension_numbers = #tpu.dot_dimension_numbers<[1], [1], [0], [0], [0, 0, 1, 0], [], []>} : vector<16x16xf32>, vector<16x16xf32>, vector<16x16xf32> -> vector<16x16xf32>
    %92 = arith.addf %91, %32 : vector<16x16xf32>
    %cst_26 = arith.constant dense<0xFF800000> : vector<16xf32>
    %93 = vector.multi_reduction <maximumf>, %92, %cst_26 [1] : vector<16x16xf32> to vector<16xf32>
    %94 = vector.shape_cast %93 : vector<16xf32> to vector<16x1xf32>
    %95 = vector.broadcast %94 : vector<16x1xf32> to vector<16x16xf32>
    %96 = arith.subf %92, %95 : vector<16x16xf32>
    %97 = math.exp %96 : vector<16x16xf32>
    %cst_27 = arith.constant dense<0.000000e+00> : vector<16xf32>
    %98 = vector.multi_reduction <add>, %97, %cst_27 [1] : vector<16x16xf32> to vector<16xf32>
    %99 = vector.shape_cast %98 : vector<16xf32> to vector<16x1xf32>
    %100 = tpu.reciprocal %99 {approx = true} : vector<16x1xf32> -> vector<16x1xf32>
    %101 = vector.broadcast %100 : vector<16x1xf32> to vector<16x16xf32>
    %102 = arith.mulf %97, %101 : vector<16x16xf32>
    %103 = vector.extract_strided_slice %76 {offsets = [0, 0], sizes = [16, 16], strides = [1, 1]} : vector<16x32xf32> to vector<16x16xf32>
    %cst_28 = arith.constant dense<0.000000e+00> : vector<16x16xf32>
    %104 = tpu.matmul %102, %103, %cst_28 {dimension_numbers = #tpu.dot_dimension_numbers<[1], [0], [0], [1], [0, 0, 1, 1], [], []>} : vector<16x16xf32>, vector<16x16xf32>, vector<16x16xf32> -> vector<16x16xf32>
    %105 = vector.extract_strided_slice %74 {offsets = [0, 16], sizes = [16, 16], strides = [1, 1]} : vector<16x32xf32> to vector<16x16xf32>
    %106 = vector.extract_strided_slice %75 {offsets = [0, 16], sizes = [16, 16], strides = [1, 1]} : vector<16x32xf32> to vector<16x16xf32>
    %cst_29 = arith.constant dense<0.000000e+00> : vector<16x16xf32>
    %107 = tpu.matmul %105, %106, %cst_29 {dimension_numbers = #tpu.dot_dimension_numbers<[1], [1], [0], [0], [0, 0, 1, 0], [], []>} : vector<16x16xf32>, vector<16x16xf32>, vector<16x16xf32> -> vector<16x16xf32>
    %108 = arith.addf %107, %32 : vector<16x16xf32>
    %cst_30 = arith.constant dense<0xFF800000> : vector<16xf32>
    %109 = vector.multi_reduction <maximumf>, %108, %cst_30 [1] : vector<16x16xf32> to vector<16xf32>
    %110 = vector.shape_cast %109 : vector<16xf32> to vector<16x1xf32>
    %111 = vector.broadcast %110 : vector<16x1xf32> to vector<16x16xf32>
    %112 = arith.subf %108, %111 : vector<16x16xf32>
    %113 = math.exp %112 : vector<16x16xf32>
    %cst_31 = arith.constant dense<0.000000e+00> : vector<16xf32>
    %114 = vector.multi_reduction <add>, %113, %cst_31 [1] : vector<16x16xf32> to vector<16xf32>
    %115 = vector.shape_cast %114 : vector<16xf32> to vector<16x1xf32>
    %116 = tpu.reciprocal %115 {approx = true} : vector<16x1xf32> -> vector<16x1xf32>
    %117 = vector.broadcast %116 : vector<16x1xf32> to vector<16x16xf32>
    %118 = arith.mulf %113, %117 : vector<16x16xf32>
    %119 = vector.extract_strided_slice %76 {offsets = [0, 16], sizes = [16, 16], strides = [1, 1]} : vector<16x32xf32> to vector<16x16xf32>
    %cst_32 = arith.constant dense<0.000000e+00> : vector<16x16xf32>
    %120 = tpu.matmul %118, %119, %cst_32 {dimension_numbers = #tpu.dot_dimension_numbers<[1], [0], [0], [1], [0, 0, 1, 1], [], []>} : vector<16x16xf32>, vector<16x16xf32>, vector<16x16xf32> -> vector<16x16xf32>
    %121 = tpu.concatenate %104, %120 in 1 : vector<16x16xf32>, vector<16x16xf32> -> vector<16x32xf32>
    %cst_33 = arith.constant dense<0.000000e+00> : vector<16x32xf32>
    %122 = tpu.matmul %121, %46, %cst_33 {dimension_numbers = #tpu.dot_dimension_numbers<[1], [0], [0], [1], [0, 0, 1, 1], [], []>} : vector<16x32xf32>, vector<32x32xf32>, vector<16x32xf32> -> vector<16x32xf32>
    %123 = arith.addf %2, %122 : vector<16x32xf32>
    %124 = vector.broadcast %39 : vector<1x32xf32> to vector<16x32xf32>
    %125 = arith.addf %123, %124 : vector<16x32xf32>
    %cst_34 = arith.constant dense<0.000000e+00> : vector<16xf32>
    %126 = vector.multi_reduction <add>, %125, %cst_34 [1] : vector<16x32xf32> to vector<16xf32>
    %127 = vector.shape_cast %126 : vector<16xf32> to vector<16x1xf32>
    %cst_35 = arith.constant 3.200000e+01 : f32
    %128 = vector.broadcast %cst_35 : f32 to vector<16x1xf32>
    %129 = arith.divf %127, %128 : vector<16x1xf32>
    %130 = vector.broadcast %129 : vector<16x1xf32> to vector<16x32xf32>
    %131 = arith.subf %125, %130 : vector<16x32xf32>
    %132 = arith.mulf %131, %131 : vector<16x32xf32>
    %cst_36 = arith.constant dense<0.000000e+00> : vector<16xf32>
    %133 = vector.multi_reduction <add>, %132, %cst_36 [1] : vector<16x32xf32> to vector<16xf32>
    %134 = vector.shape_cast %133 : vector<16xf32> to vector<16x1xf32>
    %cst_37 = arith.constant 3.200000e+01 : f32
    %135 = vector.broadcast %cst_37 : f32 to vector<16x1xf32>
    %136 = arith.divf %134, %135 : vector<16x1xf32>
    %137 = vector.broadcast %129 : vector<16x1xf32> to vector<16x32xf32>
    %138 = arith.subf %125, %137 : vector<16x32xf32>
    %cst_38 = arith.constant 9.99999974E-6 : f32
    %139 = vector.broadcast %cst_38 : f32 to vector<16x1xf32>
    %140 = arith.addf %136, %139 : vector<16x1xf32>
    %141 = math.rsqrt %140 : vector<16x1xf32>
    %142 = vector.broadcast %141 : vector<16x1xf32> to vector<16x32xf32>
    %143 = arith.mulf %138, %142 : vector<16x32xf32>
    %144 = vector.broadcast %37 : vector<1x32xf32> to vector<16x32xf32>
    %145 = arith.mulf %143, %144 : vector<16x32xf32>
    %146 = vector.broadcast %38 : vector<1x32xf32> to vector<16x32xf32>
    %147 = arith.addf %145, %146 : vector<16x32xf32>
    %c0_39 = arith.constant 0 : index
    %c0_40 = arith.constant 0 : index
    %c0_41 = arith.constant 0 : index
    %148 = vector.load %arg4[%c0_39, %c0_40, %c0_41] : memref<2x32x128xf32, #tpu.memory_space<vmem>>, vector<1x32x128xf32>
    %149 = vector.shape_cast %148 : vector<1x32x128xf32> to vector<32x128xf32>
    %cst_42 = arith.constant dense<0.000000e+00> : vector<16x128xf32>
    %150 = tpu.matmul %147, %149, %cst_42 {dimension_numbers = #tpu.dot_dimension_numbers<[1], [0], [0], [1], [0, 0, 1, 1], [], []>} : vector<16x32xf32>, vector<32x128xf32>, vector<16x128xf32> -> vector<16x128xf32>
    %151 = vector.broadcast %42 : vector<1x128xf32> to vector<16x128xf32>
    %152 = arith.addf %150, %151 : vector<16x128xf32>
    %cst_43 = arith.constant 5.000000e-01 : f32
    %153 = vector.broadcast %cst_43 : f32 to vector<16x128xf32>
    %154 = arith.mulf %153, %152 : vector<16x128xf32>
    %cst_44 = arith.constant 4.471500e-02 : f32
    %155 = vector.broadcast %cst_44 : f32 to vector<16x128xf32>
    %156 = arith.mulf %155, %152 : vector<16x128xf32>
    %157 = arith.mulf %156, %152 : vector<16x128xf32>
    %158 = arith.mulf %157, %152 : vector<16x128xf32>
    %159 = arith.addf %152, %158 : vector<16x128xf32>
    %cst_45 = arith.constant 0.797884583 : f32
    %160 = vector.broadcast %cst_45 : f32 to vector<16x128xf32>
    %161 = arith.mulf %160, %159 : vector<16x128xf32>
    %162 = math.tanh %161 : vector<16x128xf32>
    %cst_46 = arith.constant 1.000000e+00 : f32
    %163 = vector.broadcast %cst_46 : f32 to vector<16x128xf32>
    %164 = arith.addf %163, %162 : vector<16x128xf32>
    %165 = arith.mulf %154, %164 : vector<16x128xf32>
    %c0_47 = arith.constant 0 : index
    %c0_48 = arith.constant 0 : index
    %c0_49 = arith.constant 0 : index
    %166 = vector.load %arg5[%c0_47, %c0_48, %c0_49] : memref<2x128x32xf32, #tpu.memory_space<vmem>>, vector<1x128x32xf32>
    %167 = vector.shape_cast %166 : vector<1x128x32xf32> to vector<128x32xf32>
    %cst_50 = arith.constant dense<0.000000e+00> : vector<16x32xf32>
    %168 = tpu.matmul %165, %167, %cst_50 {dimension_numbers = #tpu.dot_dimension_numbers<[1], [0], [0], [1], [0, 0, 1, 1], [], []>} : vector<16x128xf32>, vector<128x32xf32>, vector<16x32xf32> -> vector<16x32xf32>
    %169 = arith.addf %125, %168 : vector<16x32xf32>
    %170 = vector.broadcast %40 : vector<1x32xf32> to vector<16x32xf32>
    %171 = arith.addf %169, %170 : vector<16x32xf32>
    %c1 = arith.constant 1 : index
    %c0_51 = arith.constant 0 : index
    %c0_52 = arith.constant 0 : index
    %172 = vector.load %arg2[%c1, %c0_51, %c0_52] : memref<3x8x128xf32, #tpu.memory_space<vmem>>, vector<1x8x128xf32>
    %173 = vector.shape_cast %172 : vector<1x8x128xf32> to vector<8x128xf32>
    %174 = vector.extract_strided_slice %173 {offsets = [0, 0], sizes = [1, 32], strides = [1, 1]} : vector<8x128xf32> to vector<1x32xf32>
    %175 = vector.extract_strided_slice %173 {offsets = [1, 0], sizes = [1, 32], strides = [1, 1]} : vector<8x128xf32> to vector<1x32xf32>
    %176 = vector.extract_strided_slice %173 {offsets = [2, 0], sizes = [1, 32], strides = [1, 1]} : vector<8x128xf32> to vector<1x32xf32>
    %177 = vector.extract_strided_slice %173 {offsets = [3, 0], sizes = [1, 32], strides = [1, 1]} : vector<8x128xf32> to vector<1x32xf32>
    %178 = vector.extract_strided_slice %173 {offsets = [4, 0], sizes = [1, 32], strides = [1, 1]} : vector<8x128xf32> to vector<1x32xf32>
    %179 = vector.extract_strided_slice %173 {offsets = [5, 0], sizes = [1, 32], strides = [1, 1]} : vector<8x128xf32> to vector<1x32xf32>
    %180 = vector.extract_strided_slice %173 {offsets = [6, 0], sizes = [1, 96], strides = [1, 1]} : vector<8x128xf32> to vector<1x96xf32>
    %181 = vector.extract_strided_slice %173 {offsets = [7, 0], sizes = [1, 128], strides = [1, 1]} : vector<8x128xf32> to vector<1x128xf32>
    %c1_53 = arith.constant 1 : index
    %c0_54 = arith.constant 0 : index
    %c0_55 = arith.constant 0 : index
    %182 = vector.load %arg3[%c1_53, %c0_54, %c0_55] : memref<2x32x128xf32, #tpu.memory_space<vmem>>, vector<1x32x128xf32>
    %183 = vector.shape_cast %182 : vector<1x32x128xf32> to vector<32x128xf32>
    %184 = vector.extract_strided_slice %183 {offsets = [0, 0], sizes = [32, 96], strides = [1, 1]} : vector<32x128xf32> to vector<32x96xf32>
    %185 = vector.extract_strided_slice %183 {offsets = [0, 96], sizes = [32, 32], strides = [1, 1]} : vector<32x128xf32> to vector<32x32xf32>
    %cst_56 = arith.constant dense<0.000000e+00> : vector<16xf32>
    %186 = vector.multi_reduction <add>, %171, %cst_56 [1] : vector<16x32xf32> to vector<16xf32>
    %187 = vector.shape_cast %186 : vector<16xf32> to vector<16x1xf32>
    %cst_57 = arith.constant 3.200000e+01 : f32
    %188 = vector.broadcast %cst_57 : f32 to vector<16x1xf32>
    %189 = arith.divf %187, %188 : vector<16x1xf32>
    %190 = vector.broadcast %189 : vector<16x1xf32> to vector<16x32xf32>
    %191 = arith.subf %171, %190 : vector<16x32xf32>
    %192 = arith.mulf %191, %191 : vector<16x32xf32>
    %cst_58 = arith.constant dense<0.000000e+00> : vector<16xf32>
    %193 = vector.multi_reduction <add>, %192, %cst_58 [1] : vector<16x32xf32> to vector<16xf32>
    %194 = vector.shape_cast %193 : vector<16xf32> to vector<16x1xf32>
    %cst_59 = arith.constant 3.200000e+01 : f32
    %195 = vector.broadcast %cst_59 : f32 to vector<16x1xf32>
    %196 = arith.divf %194, %195 : vector<16x1xf32>
    %197 = vector.broadcast %189 : vector<16x1xf32> to vector<16x32xf32>
    %198 = arith.subf %171, %197 : vector<16x32xf32>
    %cst_60 = arith.constant 9.99999974E-6 : f32
    %199 = vector.broadcast %cst_60 : f32 to vector<16x1xf32>
    %200 = arith.addf %196, %199 : vector<16x1xf32>
    %201 = math.rsqrt %200 : vector<16x1xf32>
    %202 = vector.broadcast %201 : vector<16x1xf32> to vector<16x32xf32>
    %203 = arith.mulf %198, %202 : vector<16x32xf32>
    %204 = vector.broadcast %174 : vector<1x32xf32> to vector<16x32xf32>
    %205 = arith.mulf %203, %204 : vector<16x32xf32>
    %206 = vector.broadcast %175 : vector<1x32xf32> to vector<16x32xf32>
    %207 = arith.addf %205, %206 : vector<16x32xf32>
    %cst_61 = arith.constant dense<0.000000e+00> : vector<16x96xf32>
    %208 = tpu.matmul %207, %184, %cst_61 {dimension_numbers = #tpu.dot_dimension_numbers<[1], [0], [0], [1], [0, 0, 1, 1], [], []>} : vector<16x32xf32>, vector<32x96xf32>, vector<16x96xf32> -> vector<16x96xf32>
    %209 = vector.broadcast %180 : vector<1x96xf32> to vector<16x96xf32>
    %210 = arith.addf %208, %209 : vector<16x96xf32>
    %211 = vector.extract_strided_slice %210 {offsets = [0, 0], sizes = [16, 32], strides = [1, 1]} : vector<16x96xf32> to vector<16x32xf32>
    %cst_62 = arith.constant 2.500000e-01 : f32
    %212 = vector.broadcast %cst_62 : f32 to vector<16x32xf32>
    %213 = arith.mulf %211, %212 : vector<16x32xf32>
    %214 = vector.extract_strided_slice %210 {offsets = [0, 32], sizes = [16, 32], strides = [1, 1]} : vector<16x96xf32> to vector<16x32xf32>
    %215 = vector.extract_strided_slice %210 {offsets = [0, 64], sizes = [16, 32], strides = [1, 1]} : vector<16x96xf32> to vector<16x32xf32>
    %216 = vector.extract_strided_slice %214 {offsets = [0, 0], sizes = [4, 32], strides = [1, 1]} : vector<16x32xf32> to vector<4x32xf32>
    %217 = vector.extract_strided_slice %214 {offsets = [4, 0], sizes = [4, 32], strides = [1, 1]} : vector<16x32xf32> to vector<4x32xf32>
    %218 = vector.extract_strided_slice %214 {offsets = [8, 0], sizes = [4, 32], strides = [1, 1]} : vector<16x32xf32> to vector<4x32xf32>
    %219 = vector.extract_strided_slice %214 {offsets = [12, 0], sizes = [4, 32], strides = [1, 1]} : vector<16x32xf32> to vector<4x32xf32>
    %220 = tpu.concatenate %216, %217, %218, %219 in 1 : vector<4x32xf32>, vector<4x32xf32>, vector<4x32xf32>, vector<4x32xf32> -> vector<4x128xf32>
    %c8 = arith.constant 8 : index
    %c0_63 = arith.constant 0 : index
    %221 = vector.load %arg7[%c8, %c0_63] : memref<16x128xf32, #tpu.memory_space<vmem>>, vector<4x128xf32>
    tpu.vector_store %arg7[%c8, %c0_63], %220 {strides = array<i32>} : memref<16x128xf32, #tpu.memory_space<vmem>>, vector<4x128xf32>,
    %222 = vector.extract_strided_slice %215 {offsets = [0, 0], sizes = [4, 32], strides = [1, 1]} : vector<16x32xf32> to vector<4x32xf32>
    %223 = vector.extract_strided_slice %215 {offsets = [4, 0], sizes = [4, 32], strides = [1, 1]} : vector<16x32xf32> to vector<4x32xf32>
    %224 = vector.extract_strided_slice %215 {offsets = [8, 0], sizes = [4, 32], strides = [1, 1]} : vector<16x32xf32> to vector<4x32xf32>
    %225 = vector.extract_strided_slice %215 {offsets = [12, 0], sizes = [4, 32], strides = [1, 1]} : vector<16x32xf32> to vector<4x32xf32>
    %226 = tpu.concatenate %222, %223, %224, %225 in 1 : vector<4x32xf32>, vector<4x32xf32>, vector<4x32xf32>, vector<4x32xf32> -> vector<4x128xf32>
    %c12 = arith.constant 12 : index
    %c0_64 = arith.constant 0 : index
    %227 = vector.load %arg7[%c12, %c0_64] : memref<16x128xf32, #tpu.memory_space<vmem>>, vector<4x128xf32>
    tpu.vector_store %arg7[%c12, %c0_64], %226 {strides = array<i32>} : memref<16x128xf32, #tpu.memory_space<vmem>>, vector<4x128xf32>,
    %228 = vector.extract_strided_slice %213 {offsets = [0, 0], sizes = [16, 16], strides = [1, 1]} : vector<16x32xf32> to vector<16x16xf32>
    %229 = vector.extract_strided_slice %214 {offsets = [0, 0], sizes = [16, 16], strides = [1, 1]} : vector<16x32xf32> to vector<16x16xf32>
    %cst_65 = arith.constant dense<0.000000e+00> : vector<16x16xf32>
    %230 = tpu.matmul %228, %229, %cst_65 {dimension_numbers = #tpu.dot_dimension_numbers<[1], [1], [0], [0], [0, 0, 1, 0], [], []>} : vector<16x16xf32>, vector<16x16xf32>, vector<16x16xf32> -> vector<16x16xf32>
    %231 = arith.addf %230, %32 : vector<16x16xf32>
    %cst_66 = arith.constant dense<0xFF800000> : vector<16xf32>
    %232 = vector.multi_reduction <maximumf>, %231, %cst_66 [1] : vector<16x16xf32> to vector<16xf32>
    %233 = vector.shape_cast %232 : vector<16xf32> to vector<16x1xf32>
    %234 = vector.broadcast %233 : vector<16x1xf32> to vector<16x16xf32>
    %235 = arith.subf %231, %234 : vector<16x16xf32>
    %236 = math.exp %235 : vector<16x16xf32>
    %cst_67 = arith.constant dense<0.000000e+00> : vector<16xf32>
    %237 = vector.multi_reduction <add>, %236, %cst_67 [1] : vector<16x16xf32> to vector<16xf32>
    %238 = vector.shape_cast %237 : vector<16xf32> to vector<16x1xf32>
    %239 = tpu.reciprocal %238 {approx = true} : vector<16x1xf32> -> vector<16x1xf32>
    %240 = vector.broadcast %239 : vector<16x1xf32> to vector<16x16xf32>
    %241 = arith.mulf %236, %240 : vector<16x16xf32>
    %242 = vector.extract_strided_slice %215 {offsets = [0, 0], sizes = [16, 16], strides = [1, 1]} : vector<16x32xf32> to vector<16x16xf32>
    %cst_68 = arith.constant dense<0.000000e+00> : vector<16x16xf32>
    %243 = tpu.matmul %241, %242, %cst_68 {dimension_numbers = #tpu.dot_dimension_numbers<[1], [0], [0], [1], [0, 0, 1, 1], [], []>} : vector<16x16xf32>, vector<16x16xf32>, vector<16x16xf32> -> vector<16x16xf32>
    %244 = vector.extract_strided_slice %213 {offsets = [0, 16], sizes = [16, 16], strides = [1, 1]} : vector<16x32xf32> to vector<16x16xf32>
    %245 = vector.extract_strided_slice %214 {offsets = [0, 16], sizes = [16, 16], strides = [1, 1]} : vector<16x32xf32> to vector<16x16xf32>
    %cst_69 = arith.constant dense<0.000000e+00> : vector<16x16xf32>
    %246 = tpu.matmul %244, %245, %cst_69 {dimension_numbers = #tpu.dot_dimension_numbers<[1], [1], [0], [0], [0, 0, 1, 0], [], []>} : vector<16x16xf32>, vector<16x16xf32>, vector<16x16xf32> -> vector<16x16xf32>
    %247 = arith.addf %246, %32 : vector<16x16xf32>
    %cst_70 = arith.constant dense<0xFF800000> : vector<16xf32>
    %248 = vector.multi_reduction <maximumf>, %247, %cst_70 [1] : vector<16x16xf32> to vector<16xf32>
    %249 = vector.shape_cast %248 : vector<16xf32> to vector<16x1xf32>
    %250 = vector.broadcast %249 : vector<16x1xf32> to vector<16x16xf32>
    %251 = arith.subf %247, %250 : vector<16x16xf32>
    %252 = math.exp %251 : vector<16x16xf32>
    %cst_71 = arith.constant dense<0.000000e+00> : vector<16xf32>
    %253 = vector.multi_reduction <add>, %252, %cst_71 [1] : vector<16x16xf32> to vector<16xf32>
    %254 = vector.shape_cast %253 : vector<16xf32> to vector<16x1xf32>
    %255 = tpu.reciprocal %254 {approx = true} : vector<16x1xf32> -> vector<16x1xf32>
    %256 = vector.broadcast %255 : vector<16x1xf32> to vector<16x16xf32>
    %257 = arith.mulf %252, %256 : vector<16x16xf32>
    %258 = vector.extract_strided_slice %215 {offsets = [0, 16], sizes = [16, 16], strides = [1, 1]} : vector<16x32xf32> to vector<16x16xf32>
    %cst_72 = arith.constant dense<0.000000e+00> : vector<16x16xf32>
    %259 = tpu.matmul %257, %258, %cst_72 {dimension_numbers = #tpu.dot_dimension_numbers<[1], [0], [0], [1], [0, 0, 1, 1], [], []>} : vector<16x16xf32>, vector<16x16xf32>, vector<16x16xf32> -> vector<16x16xf32>
    %260 = tpu.concatenate %243, %259 in 1 : vector<16x16xf32>, vector<16x16xf32> -> vector<16x32xf32>
    %cst_73 = arith.constant dense<0.000000e+00> : vector<16x32xf32>
    %261 = tpu.matmul %260, %185, %cst_73 {dimension_numbers = #tpu.dot_dimension_numbers<[1], [0], [0], [1], [0, 0, 1, 1], [], []>} : vector<16x32xf32>, vector<32x32xf32>, vector<16x32xf32> -> vector<16x32xf32>
    %262 = arith.addf %171, %261 : vector<16x32xf32>
    %263 = vector.broadcast %178 : vector<1x32xf32> to vector<16x32xf32>
    %264 = arith.addf %262, %263 : vector<16x32xf32>
    %cst_74 = arith.constant dense<0.000000e+00> : vector<16xf32>
    %265 = vector.multi_reduction <add>, %264, %cst_74 [1] : vector<16x32xf32> to vector<16xf32>
    %266 = vector.shape_cast %265 : vector<16xf32> to vector<16x1xf32>
    %cst_75 = arith.constant 3.200000e+01 : f32
    %267 = vector.broadcast %cst_75 : f32 to vector<16x1xf32>
    %268 = arith.divf %266, %267 : vector<16x1xf32>
    %269 = vector.broadcast %268 : vector<16x1xf32> to vector<16x32xf32>
    %270 = arith.subf %264, %269 : vector<16x32xf32>
    %271 = arith.mulf %270, %270 : vector<16x32xf32>
    %cst_76 = arith.constant dense<0.000000e+00> : vector<16xf32>
    %272 = vector.multi_reduction <add>, %271, %cst_76 [1] : vector<16x32xf32> to vector<16xf32>
    %273 = vector.shape_cast %272 : vector<16xf32> to vector<16x1xf32>
    %cst_77 = arith.constant 3.200000e+01 : f32
    %274 = vector.broadcast %cst_77 : f32 to vector<16x1xf32>
    %275 = arith.divf %273, %274 : vector<16x1xf32>
    %276 = vector.broadcast %268 : vector<16x1xf32> to vector<16x32xf32>
    %277 = arith.subf %264, %276 : vector<16x32xf32>
    %cst_78 = arith.constant 9.99999974E-6 : f32
    %278 = vector.broadcast %cst_78 : f32 to vector<16x1xf32>
    %279 = arith.addf %275, %278 : vector<16x1xf32>
    %280 = math.rsqrt %279 : vector<16x1xf32>
    %281 = vector.broadcast %280 : vector<16x1xf32> to vector<16x32xf32>
    %282 = arith.mulf %277, %281 : vector<16x32xf32>
    %283 = vector.broadcast %176 : vector<1x32xf32> to vector<16x32xf32>
    %284 = arith.mulf %282, %283 : vector<16x32xf32>
    %285 = vector.broadcast %177 : vector<1x32xf32> to vector<16x32xf32>
    %286 = arith.addf %284, %285 : vector<16x32xf32>
    %c1_79 = arith.constant 1 : index
    %c0_80 = arith.constant 0 : index
    %c0_81 = arith.constant 0 : index
    %287 = vector.load %arg4[%c1_79, %c0_80, %c0_81] : memref<2x32x128xf32, #tpu.memory_space<vmem>>, vector<1x32x128xf32>
    %288 = vector.shape_cast %287 : vector<1x32x128xf32> to vector<32x128xf32>
    %cst_82 = arith.constant dense<0.000000e+00> : vector<16x128xf32>
    %289 = tpu.matmul %286, %288, %cst_82 {dimension_numbers = #tpu.dot_dimension_numbers<[1], [0], [0], [1], [0, 0, 1, 1], [], []>} : vector<16x32xf32>, vector<32x128xf32>, vector<16x128xf32> -> vector<16x128xf32>
    %290 = vector.broadcast %181 : vector<1x128xf32> to vector<16x128xf32>
    %291 = arith.addf %289, %290 : vector<16x128xf32>
    %cst_83 = arith.constant 5.000000e-01 : f32
    %292 = vector.broadcast %cst_83 : f32 to vector<16x128xf32>
    %293 = arith.mulf %292, %291 : vector<16x128xf32>
    %cst_84 = arith.constant 4.471500e-02 : f32
    %294 = vector.broadcast %cst_84 : f32 to vector<16x128xf32>
    %295 = arith.mulf %294, %291 : vector<16x128xf32>
    %296 = arith.mulf %295, %291 : vector<16x128xf32>
    %297 = arith.mulf %296, %291 : vector<16x128xf32>
    %298 = arith.addf %291, %297 : vector<16x128xf32>
    %cst_85 = arith.constant 0.797884583 : f32
    %299 = vector.broadcast %cst_85 : f32 to vector<16x128xf32>
    %300 = arith.mulf %299, %298 : vector<16x128xf32>
    %301 = math.tanh %300 : vector<16x128xf32>
    %cst_86 = arith.constant 1.000000e+00 : f32
    %302 = vector.broadcast %cst_86 : f32 to vector<16x128xf32>
    %303 = arith.addf %302, %301 : vector<16x128xf32>
    %304 = arith.mulf %293, %303 : vector<16x128xf32>
    %c1_87 = arith.constant 1 : index
    %c0_88 = arith.constant 0 : index
    %c0_89 = arith.constant 0 : index
    %305 = vector.load %arg5[%c1_87, %c0_88, %c0_89] : memref<2x128x32xf32, #tpu.memory_space<vmem>>, vector<1x128x32xf32>
    %306 = vector.shape_cast %305 : vector<1x128x32xf32> to vector<128x32xf32>
    %cst_90 = arith.constant dense<0.000000e+00> : vector<16x32xf32>
    %307 = tpu.matmul %304, %306, %cst_90 {dimension_numbers = #tpu.dot_dimension_numbers<[1], [0], [0], [1], [0, 0, 1, 1], [], []>} : vector<16x128xf32>, vector<128x32xf32>, vector<16x32xf32> -> vector<16x32xf32>
    %308 = arith.addf %264, %307 : vector<16x32xf32>
    %309 = vector.broadcast %179 : vector<1x32xf32> to vector<16x32xf32>
    %310 = arith.addf %308, %309 : vector<16x32xf32>
    %c2 = arith.constant 2 : index
    %c0_91 = arith.constant 0 : index
    %c0_92 = arith.constant 0 : index
    %311 = vector.load %arg2[%c2, %c0_91, %c0_92] : memref<3x8x128xf32, #tpu.memory_space<vmem>>, vector<1x8x128xf32>
    %312 = vector.shape_cast %311 : vector<1x8x128xf32> to vector<8x128xf32>
    %313 = vector.extract_strided_slice %312 {offsets = [0, 0], sizes = [1, 32], strides = [1, 1]} : vector<8x128xf32> to vector<1x32xf32>
    %314 = vector.extract_strided_slice %312 {offsets = [1, 0], sizes = [1, 32], strides = [1, 1]} : vector<8x128xf32> to vector<1x32xf32>
    %cst_93 = arith.constant dense<0.000000e+00> : vector<16xf32>
    %315 = vector.multi_reduction <add>, %310, %cst_93 [1] : vector<16x32xf32> to vector<16xf32>
    %316 = vector.shape_cast %315 : vector<16xf32> to vector<16x1xf32>
    %cst_94 = arith.constant 3.200000e+01 : f32
    %317 = vector.broadcast %cst_94 : f32 to vector<16x1xf32>
    %318 = arith.divf %316, %317 : vector<16x1xf32>
    %319 = vector.broadcast %318 : vector<16x1xf32> to vector<16x32xf32>
    %320 = arith.subf %310, %319 : vector<16x32xf32>
    %321 = arith.mulf %320, %320 : vector<16x32xf32>
    %cst_95 = arith.constant dense<0.000000e+00> : vector<16xf32>
    %322 = vector.multi_reduction <add>, %321, %cst_95 [1] : vector<16x32xf32> to vector<16xf32>
    %323 = vector.shape_cast %322 : vector<16xf32> to vector<16x1xf32>
    %cst_96 = arith.constant 3.200000e+01 : f32
    %324 = vector.broadcast %cst_96 : f32 to vector<16x1xf32>
    %325 = arith.divf %323, %324 : vector<16x1xf32>
    %326 = vector.broadcast %318 : vector<16x1xf32> to vector<16x32xf32>
    %327 = arith.subf %310, %326 : vector<16x32xf32>
    %cst_97 = arith.constant 9.99999974E-6 : f32
    %328 = vector.broadcast %cst_97 : f32 to vector<16x1xf32>
    %329 = arith.addf %325, %328 : vector<16x1xf32>
    %330 = math.rsqrt %329 : vector<16x1xf32>
    %331 = vector.broadcast %330 : vector<16x1xf32> to vector<16x32xf32>
    %332 = arith.mulf %327, %331 : vector<16x32xf32>
    %333 = vector.broadcast %313 : vector<1x32xf32> to vector<16x32xf32>
    %334 = arith.mulf %332, %333 : vector<16x32xf32>
    %335 = vector.broadcast %314 : vector<1x32xf32> to vector<16x32xf32>
    %336 = arith.addf %334, %335 : vector<16x32xf32>
    %337 = vector.extract_strided_slice %336 {offsets = [0, 0], sizes = [4, 32], strides = [1, 1]} : vector<16x32xf32> to vector<4x32xf32>
    %338 = vector.extract_strided_slice %336 {offsets = [4, 0], sizes = [4, 32], strides = [1, 1]} : vector<16x32xf32> to vector<4x32xf32>
    %339 = vector.extract_strided_slice %336 {offsets = [8, 0], sizes = [4, 32], strides = [1, 1]} : vector<16x32xf32> to vector<4x32xf32>
    %340 = vector.extract_strided_slice %336 {offsets = [12, 0], sizes = [4, 32], strides = [1, 1]} : vector<16x32xf32> to vector<4x32xf32>
    %341 = tpu.concatenate %337, %338, %339, %340 in 1 : vector<4x32xf32>, vector<4x32xf32>, vector<4x32xf32>, vector<4x32xf32> -> vector<4x128xf32>
    %c0_98 = arith.constant 0 : index
    %c0_99 = arith.constant 0 : index
    %342 = vector.load %arg6[%c0_98, %c0_99] : memref<4x128xf32, #tpu.memory_space<vmem>>, vector<4x128xf32>
    tpu.vector_store %arg6[%c0_98, %c0_99], %341 {strides = array<i32>} : memref<4x128xf32, #tpu.memory_space<vmem>>, vector<4x128xf32>,
    return
  }
}

</mosaic_0001>

<bundles_post_ra>
// kernel: gpt2_forward.1
= control target key start
LH: loop header
LB: loop body
LE: loop exit
PB: predicated region body
PF: predicated region fallthrough
CT: control target
= control target key end

     0   :  { %vm71_vm0 = vcmask 261120   ;;  %v31_v27 = vlaneseq  ;;  %s2584_s17 = smov 96   ;;  %vm233_vm1 = vcmask 130048   ;;  %s2585_s18 = smov 80   ;;  %vm213_vm11 = vcmask 523264   ;;  %s3160_s0 = inlined_call_operand.vmem [shape: f32[16,32], index: 0, kind: input, shape index: {}]   ;;  %s3161_s1 = inlined_call_operand.vmem [shape: f32[16,32], index: 1, kind: input, shape index: {}]   ;;  %s3162_s3 = inlined_call_operand.vmem [shape: f32[2,32,128], index: 3, kind: input, shape index: {}]   ;;  %s3163_s2 = inlined_call_operand.vmem [shape: f32[3,8,128], index: 2, kind: input, shape index: {}]   ;;  %s3164_s4 = inlined_call_operand.vmem [shape: f32[2,32,128], index: 4, kind: input, shape index: {}]   ;;  %s3165_s5 = inlined_call_operand.vmem [shape: f32[2,128,32], index: 5, kind: input, shape index: {}]   ;;  %s3166_s7 = inlined_call_operand.vmem [shape: f32[16,128], index: 7, kind: output, shape index: {1}]   ;;  %s3167_s6 = inlined_call_operand.vmem [shape: f32[4,128], index: 6, kind: output, shape index: {0}]  }
   0x1   :  { %v25_v0 = vld [vmem:[%s3160_s0] sm:$0xff]  ;;  %v26_v2 = vld [vmem:[%s3160_s0 + $0x8] sm:$0xff]  ;;  %v2669_v20 = vld [vmem:[%s3162_s3 + $0x10] sm:$0xff]  ;;  %s2586_s19 = smov 112   ;;  %s2588_s20 = smov 64   ;;  %vm215_vm12 = vcmask 785408  }
   0x2   :  { %v27_v1 = vld [vmem:[%s3161_s1] sm:$0xff]  ;;  %v28_v4 = vld [vmem:[%s3161_s1 + $0x8] sm:$0xff]  ;;  %v2678_v23 = vld [vmem:[%s3162_s3 + $0x18] sm:$0xff]  ;;  %v2682_v31 = vshrl.u32 %v31_v27, 7  ;;  %s2589_s21 = smov 48   ;;  %s2590_s22 = smov 32  }
   0x3   :  { %v2641_v3 = vadd.f32 %v27_v1, %v25_v0  ;;  %v2646_v5 = vadd.f32 %v28_v4, %v26_v2  ;;  %v2659_v18 = vld [vmem:[%s3162_s3] sm:$0xff]  ;;  %v2664_v19 = vld [vmem:[%s3162_s3 + $0x8] sm:$0xff]  ;;  %v2328_v24 = vpack.c.bf16 %v2678_v23, %v2669_v20  ;;  %vm2728_vm2 = vmpackc.low %vm233_vm1, %vm233_vm1  ;;  %v35_v1 = vand.u32 127, %v31_v27  ;;  %s2591_s23 = smov 16  }
   0x4   :  { %v2494_v21 = vpack.i.bf16 %v2664_v19, %v2659_v18  ;;  %v2324_v22 = vpack.c.bf16 %v2664_v19, %v2659_v18  ;;  %v2685_v33 = vsub.s32 0, %v2682_v31  ;;  %v2690_v34 = vld [vmem:[%s3163_s2] sm:$0xff]  ;;  %v2693_v35 = vsub.s32 1, %v2682_v31 }
   0x5   :  { %v72_v6 = vsel %vm71_vm0, %v2641_v3, 0.0  ;;  %v75_v7 = vsel %vm71_vm0, %v2646_v5, 0.0  ;;  %v113_v46 = vsub.s32 6, %v2682_v31  ;;  %v33_v2 = vadd.s32 8, %v2682_v31 }
   0x6   :  { %73 = vadd.xlane.f32.xlu0 %v72_v6  ;;  %2325 = vmatprep.subr.bf16.mxu1 %v2324_v22  ;;  %v102_v36 = vrot.slane %v2690_v34, %v2685_v33  ;;  %v108_v39 = vrot.slane %v2690_v34, %v2693_v35  ;;  %vm53_vm3 = vcmp.ge.s32.totalorder %v35_v1, 8  ;;  %vm54_vm4 = vcmp.lt.s32.totalorder %v35_v1, 16 }
   0x7   :  { %2327 = vmatpush3.bf16.msra.mxu1 %v2324_v22  ;;  %v114_v47 = vrot.slane %v2690_v34, %v113_v46  ;;  %vm55_vm5 = vmand %vm53_vm3, %vm54_vm4  ;;  %vm61_vm6 = vcmp.le.s32.totalorder %v35_v1, %v33_v2  ;;  %vm43_vm7 = vcmp.lt.s32.totalorder %v35_v1, 8  ;;  %vm60_vm8 = vcmp.le.s32.totalorder %v35_v1, %v2682_v31 }
   0x8   :  { %2329 = vmatprep.subr.bf16.mxu1 %v2328_v24  ;;  %vm63_vm9 = vmand %vm55_vm5, %vm61_vm6  ;;  %v2587_v4 = vmov -1e+30  }
   0x9   :  { %vm62_vm10 = vmand %vm43_vm7, %vm60_vm8  ;;  %v2746_v6 = vsel %vm63_vm9, 0.0, %v2587_v4 }
   0xa   :  { %76 = vadd.xlane.f32.xlu0 %v75_v7  ;;  %v2748_v7 = vsel %vm62_vm10, 0.0, %v2587_v4 }
   0xb   :  { %2331 = vmatpush3.bf16.msra.mxu1 %v2328_v24 }
  0x93   :  { %v74_v8 = vpop.xlane.xlu0 %73 }
  0x94   :  { %v79_v9 = vmul.f32 0.03125, %v74_v8 }
  0x96   :  { %v81_v10 = vsub.f32 %v2641_v3, %v79_v9 }
  0x97   :  { %v77_v11 = vpop.xlane.xlu0 %76 }
  0x98   :  { %v80_v12 = vmul.f32 0.03125, %v77_v11  ;;  %v83_v13 = vmul.f32 %v81_v10, %v81_v10 }
  0x9a   :  { %v82_v14 = vsub.f32 %v2646_v5, %v80_v12  ;;  %v85_v15 = vsel %vm71_vm0, %v83_v13, 0.0 }
  0x9b   :  { %86 = vadd.xlane.f32.xlu1 %v85_v15 }
  0x9c   :  { %v84_v16 = vmul.f32 %v82_v14, %v82_v14 }
  0x9e   :  { %v88_v17 = vsel %vm71_vm0, %v84_v16, 0.0 }
  0x9f   :  { %89 = vadd.xlane.f32.xlu1 %v88_v17 }
 0x128   :  { %v87_v25 = vpop.xlane.xlu1 %86 }
 0x129   :  { %v91_v26 = vmul.f32 0.03125, %v87_v25 }
 0x12b   :  { %v93_v28 = vadd.f32 1e-05, %v91_v26 }
 0x12c   :  { %v90_v29 = vpop.xlane.xlu1 %89 }
 0x12d   :  { %2524 = vrsqrt.f32 %v93_v28  ;;  %v92_v30 = vmul.f32 0.03125, %v90_v29 }
 0x12f   :  { %v94_v32 = vadd.f32 1e-05, %v92_v30 }
 0x131   :  { %2526 = vrsqrt.f32 %v94_v32 }
 0x137   :  { %v2525_v37 = vpop.eup %2524 }
 0x138   :  { %v97_v38 = vmul.f32 %v2525_v37, %v81_v10 }
 0x13a   :  { %v103_v40 = vmul.f32 %v102_v36, %v97_v38 }
 0x13b   :  { %v2527_v41 = vpop.eup %2526 }
 0x13c   :  { %v98_v42 = vmul.f32 %v2527_v41, %v82_v14  ;;  %v109_v43 = vadd.f32 %v108_v39, %v103_v40 }
 0x13e   :  { %v104_v44 = vmul.f32 %v102_v36, %v98_v42  ;;  %2140 = vmatprep.mubr.msk.f32.mxu1 %vm71_vm0, %v109_v43 }
 0x140   :  { %v110_v45 = vadd.f32 %v108_v39, %v104_v44 }
 0x142   :  { %2141 = vmatmul.mubr.msk.f32.vlgmr.msra.gmra.mrb[0].mxu1 %vm71_vm0, %v110_v45 }
 0x215   :  { %v2142_v48 = vpop.f32.mrb[0].mxu1 }
 0x216   :  { %v2705_v49 = vadd.f32 %v2142_v48, %v114_v47  ;;  %v187_v50 = vpop.f32.mrb[1].mxu1 }
 0x217   :  { %v2707_v51 = vadd.f32 %v187_v50, %v114_v47 }
 0x218   :  { %231 = vrot.lane.b32.xlu1 %v2705_v49, %s2584_s17  ;;  %v197_v54 = vmul.f32 0.25, %v2705_v49 }
 0x219   :  { %199 = vrot.lane.b32.xlu0 %v2707_v51, %s2584_s17  ;;  %v196_v52 = vmul.f32 0.25, %v2707_v51  ;;  %v2716_v53 = vpack.i.bf16 %v2705_v49, %v2707_v51 }
 0x21b   :  { %2147 = vmatprep.mubr.msk.f32.mxu1 %vm233_vm1, %v196_v52 }
 0x21c   :  { %2485 = vrot.lane.b32.xlu1 %v2716_v53, %s2585_s18 }
 0x21d   :  { %427 = vrot.lane.b32.xlu0 %v197_v54, %s2586_s19 }
 0x220   :  { %425 = vrot.lane.b32.xlu1 %v196_v52, %s2586_s19  ;;  %v2499_v52 = vpack.i.bf16 %v2678_v23, %v2669_v20 }
 0x28a   :  { %v232_v55 = vpop.permute.xlu1 %231 }
 0x28b   :  { %v2724_v56 = vpop.permute.xlu0 %199 }
 0x28c   :  { %v2332_v58 = vpack.c.bf16 %v232_v55, %v2724_v56 }
 0x28e   :  { %v2486_v59 = vpop.permute.xlu1 %2485  ;;  %2334 = vmatprep.subr.msk.bf16.mxu1 %vm2728_vm2, %v2332_v58 }
 0x28f   :  { %v2488_v60 = vunpack.i.h.bf16 %v2486_v59  ;;  %v2487_v61 = vunpack.i.l.bf16 %v2486_v59  ;;  %2337 = vmatpush3.bf16.xpose.msk.msra.mxu1 %vm2728_vm2, %v2332_v58  ;;  %v428_v0 = vpop.permute.xlu0 %427 }
 0x291   :  { %v2342_v62 = vpack.c.bf16 %v2488_v60, %v2487_v61 }
 0x292   :  { %v426_v63 = vpop.permute.xlu1 %425 }
 0x293   :  { %2344 = vmatprep.subr.msk.bf16.mxu1 %vm2728_vm2, %v2342_v62 }
 0x296   :  { %2148 = vmatmul.mubr.msk.f32.vlgmr.msra.gmra.mrb[2].mxu1 %vm233_vm1, %v197_v54 }
 0x297   :  { %2347 = vmatpush3.bf16.xpose.msk.msra.mxu1 %vm2728_vm2, %v2342_v62  ;;  %2161 = vmatprep.mubr.msk.f32.mxu1 %vm233_vm1, %v426_v63 }
 0x29e   :  { %2162 = vmatmul.mubr.msk.f32.vlgmr.msra.gmra.mrb[4].mxu1 %vm233_vm1, %v428_v0 }
 0x369   :  { %v2149_v8 = vpop.f32.mrb[2].mxu1 }
 0x36a   :  { %v316_v9 = vadd.f32 %v2149_v8, %v2746_v6  ;;  %v310_v10 = vpop.f32.mrb[3].mxu1 }
 0x36b   :  { %v311_v11 = vadd.f32 %v310_v10, %v2748_v7 }
 0x36c   :  { %v322_v12 = vsel %vm233_vm1, %v316_v9, -inf }
 0x36d   :  { %323 = vmax.xlane.f32.xlu0 %v322_v12  ;;  %v319_v13 = vsel %vm233_vm1, %v311_v11, -inf }
 0x36e   :  { %320 = vmax.xlane.f32.xlu1 %v319_v13 }
 0x371   :  { %v2163_v14 = vpop.f32.mrb[4].mxu1 }
 0x372   :  { %v507_v15 = vpop.f32.mrb[5].mxu1  ;;  %v513_v17 = vadd.f32 %v2163_v14, %v2746_v6 }
 0x373   :  { %v508_v16 = vadd.f32 %v507_v15, %v2748_v7 }
 0x374   :  { %v519_v24 = vsel %vm233_vm1, %v513_v17, -inf }
 0x375   :  { %v516_v22 = vsel %vm233_vm1, %v508_v16, -inf }
 0x376   :  { %517 = vmax.xlane.f32.xlu0 %v516_v22 }
 0x37a   :  { %520 = vmax.xlane.f32.xlu0 %v519_v24 }
 0x37f   :  { %218 = vrot.lane.b32.xlu1 %v2707_v51, %s2588_s20 }
 0x3fa   :  { %v324_v25 = vpop.xlane.xlu0 %323 }
 0x3fb   :  { %v326_v26 = vsub.f32 %v316_v9, %v324_v25  ;;  %v321_v27 = vpop.xlane.xlu1 %320 }
 0x3fc   :  { %v325_v28 = vsub.f32 %v311_v11, %v321_v27 }
 0x3fd   :  { %v329_v29 = vmul.f32 1.442695, %v326_v26 }
 0x3fe   :  { %v327_v30 = vmul.f32 1.442695, %v325_v28 }
 0x3ff   :  { %2528 = vpow2.f32 %v329_v29  ;;  %v2775_v54 = vpop.permute.xlu1 %218 }
 0x400   :  { %2530 = vpow2.f32 %v327_v30  ;;  %v736_v30 = vsub.s32 4, %v2682_v31 }
 0x403   :  { %v518_v32 = vpop.xlane.xlu0 %517 }
 0x404   :  { %v522_v36 = vsub.f32 %v508_v16, %v518_v32  ;;  %v737_v32 = vrot.slane %v2690_v34, %v736_v30 }
 0x406   :  { %v524_v37 = vmul.f32 1.442695, %v522_v36 }
 0x407   :  { %v521_v38 = vpop.xlane.xlu0 %520 }
 0x408   :  { %2532 = vpow2.f32 %v524_v37  ;;  %v523_v39 = vsub.f32 %v513_v17, %v521_v38 }
 0x409   :  { %v2529_v40 = vpop.eup %2528 }
 0x40a   :  { %v2531_v41 = vpop.eup %2530  ;;  %v526_v42 = vmul.f32 1.442695, %v523_v39  ;;  %v334_v43 = vsel %vm233_vm1, %v2529_v40, 0.0 }
 0x40b   :  { %335 = vadd.xlane.f32.xlu0 %v334_v43  ;;  %v331_v44 = vsel %vm233_vm1, %v2531_v41, 0.0 }
 0x40c   :  { %2534 = vpow2.f32 %v526_v42  ;;  %332 = vadd.xlane.f32.xlu1 %v331_v44 }
 0x412   :  { %v2533_v45 = vpop.eup %2532 }
 0x413   :  { %v528_v47 = vsel %vm233_vm1, %v2533_v45, 0.0 }
 0x414   :  { %529 = vadd.xlane.f32.xlu1 %v528_v47 }
 0x416   :  { %v2535_v48 = vpop.eup %2534 }
 0x417   :  { %v531_v50 = vsel %vm233_vm1, %v2535_v48, 0.0 }
 0x418   :  { %532 = vadd.xlane.f32.xlu0 %v531_v50 }
 0x425   :  { %2490 = vrot.lane.b32.xlu1 %v2716_v53, %s2589_s21 }
 0x429   :  { %2495 = vrot.lane.b32.xlu1 %v2494_v21, %s2590_s22 }
 0x42d   :  { %2500 = vrot.lane.b32.xlu1 %v2499_v52, %s2590_s22 }
 0x42e   :  { %341 = vrot.lane.b32.xlu0 %v2705_v49, %s2588_s20 }
 0x498   :  { %v336_v58 = vpop.xlane.xlu0 %335 }
 0x499   :  { %v333_v55 = vpop.xlane.xlu1 %332 }
 0x49a   :  { %2536 = vrcp.f32 %v333_v55 }
 0x49b   :  { %2538 = vrcp.f32 %v336_v58 }
 0x4a1   :  { %v530_v53 = vpop.xlane.xlu1 %529 }
 0x4a2   :  { %2540 = vrcp.f32 %v530_v53  ;;  %v778_v53 = vld [vmem:[%s3164_s4] sm:$0xff] }
 0x4a4   :  { %v2537_v59 = vpop.eup %2536 }
 0x4a5   :  { %v533_v60 = vpop.xlane.xlu0 %532  ;;  %v2491_v61 = vpop.permute.xlu1 %2490  ;;  %v339_v62 = vmul.f32 %v2537_v59, %v2531_v41  ;;  %v779_v59 = vld [vmem:[%s3164_s4 + $0x8] sm:$0xff] }
 0x4a6   :  { %2542 = vrcp.f32 %v533_v60  ;;  %v2493_v18 = vunpack.i.h.bf16 %v2491_v61  ;;  %v2492_v19 = vunpack.i.l.bf16 %v2491_v61  ;;  %v2539_v23 = vpop.eup %2538  ;;  %v2360_v60 = vpack.c.bf16 %v779_v59, %v778_v53  ;;  %v780_v61 = vld [vmem:[%s3164_s4 + $0x10] sm:$0xff] }
 0x4a7   :  { %2154 = vmatprep.mubr.msk.f32.mxu0 %vm233_vm1, %v339_v62  ;;  %v340_v1 = vmul.f32 %v2539_v23, %v2529_v40  ;;  %v781_v62 = vld [vmem:[%s3164_s4 + $0x18] sm:$0xff] }
 0x4a8   :  { %v2348_v0 = vpack.c.bf16 %v2493_v18, %v2492_v19  ;;  %v2364_v18 = vpack.c.bf16 %v781_v62, %v780_v61  ;;  %v885_v19 = vld [vmem:[%s3165_s5] sm:$0xff] }
 0x4a9   :  { %v342_v20 = vpop.permute.xlu0 %341  ;;  %v2496_v9 = vpop.permute.xlu1 %2495 }
 0x4aa   :  { %v2338_v21 = vpack.c.bf16 %v342_v20, %v2775_v54  ;;  %v2498_v10 = vunpack.i.h.bf16 %v2496_v9  ;;  %v2497_v11 = vunpack.i.l.bf16 %v2496_v9  ;;  %v886_v20 = vld [vmem:[%s3165_s5 + $0x8] sm:$0xff]  ;;  %v774_v9 = vsub.s32 3, %v2682_v31 }
 0x4ac   :  { %v2541_v63 = vpop.eup %2540  ;;  %2339 = vmatprep.subr.bf16.mxu0 %v2338_v21  ;;  %v2352_v12 = vpack.c.bf16 %v2498_v10, %v2497_v11 }
 0x4ad   :  { %2341 = vmatpush3.bf16.msra.mxu0 %v2338_v21  ;;  %v536_v2 = vmul.f32 %v2541_v63, %v2533_v45  ;;  %v2501_v13 = vpop.permute.xlu1 %2500  ;;  %v2368_v21 = vpack.c.bf16 %v886_v20, %v885_v19 }
 0x4ae   :  { %2349 = vmatprep.subr.bf16.mxu0 %v2348_v0  ;;  %v2503_v14 = vunpack.i.h.bf16 %v2501_v13  ;;  %v2502_v15 = vunpack.i.l.bf16 %v2501_v13  ;;  %2353 = vmatprep.subr.bf16.mxu1 %v2352_v12  ;;  %v775_v13 = vrot.slane %v2690_v34, %v774_v9 }
 0x4af   :  { %2355 = vmatpush3.bf16.msra.mxu1 %v2352_v12 }
 0x4b0   :  { %v2543_v4 = vpop.eup %2542  ;;  %2155 = vmatmul.mubr.msk.f32.vlgmr.msra.gmra.mrb[0].mxu0 %vm233_vm1, %v340_v1  ;;  %v2356_v16 = vpack.c.bf16 %v2503_v14, %v2502_v15 }
 0x4b1   :  { %v537_v8 = vmul.f32 %v2543_v4, %v2535_v48  ;;  %2351 = vmatpush3.bf16.msra.mxu0 %v2348_v0  ;;  %2168 = vmatprep.mubr.msk.f32.mxu0 %vm233_vm1, %v536_v2 }
 0x4b2   :  { %2357 = vmatprep.subr.bf16.mxu1 %v2356_v16  ;;  %2369 = vmatprep.subr.bf16.mxu0 %v2368_v21 }
 0x4b3   :  { %2359 = vmatpush3.bf16.msra.mxu1 %v2356_v16 }
 0x4b4   :  { %2169 = vmatmul.mubr.msk.f32.vlgmr.msra.gmra.mrb[2].mxu0 %vm233_vm1, %v537_v8  ;;  %2361 = vmatprep.subr.bf16.mxu1 %v2360_v60  ;;  %v768_v8 = vsub.s32 2, %v2682_v31 }
 0x4b5   :  { %2371 = vmatpush3.bf16.msra.mxu0 %v2368_v21 }
 0x4b6   :  { %v769_v10 = vrot.slane %v2690_v34, %v768_v8 }
 0x583   :  { %v2156_v17 = vpop.f32.mrb[0].mxu0 }
 0x584   :  { %v416_v22 = vpop.f32.mrb[1].mxu0 }
 0x587   :  { %v2170_v24 = vpop.f32.mrb[2].mxu0 }
 0x588   :  { %629 = vrot.lane.b32.xlu1 %v2170_v24, %s2591_s23  ;;  %v616_v25 = vpop.f32.mrb[3].mxu0 }
 0x589   :  { %627 = vrot.lane.b32.xlu0 %v616_v25, %s2591_s23  ;;  %v887_v25 = vld [vmem:[%s3165_s5 + $0x10] sm:$0xff] }
 0x5fa   :  { %v630_v26 = vpop.permute.xlu1 %629 }
 0x5fb   :  { %v628_v27 = vpop.permute.xlu0 %627  ;;  %v634_v29 = vsel %vm233_vm1, %v2156_v17, %v630_v26  ;;  %v888_v26 = vld [vmem:[%s3165_s5 + $0x18] sm:$0xff] }
 0x5fc   :  { %v633_v28 = vsel %vm233_vm1, %v416_v22, %v628_v27  ;;  %v2372_v27 = vpack.c.bf16 %v888_v26, %v887_v25 }
 0x5fd   :  { %2179 = vmatprep.mubr.msk.f32.mxu1 %vm71_vm0, %v633_v28  ;;  %v889_v28 = vld [vmem:[%s3165_s5 + $0x20] sm:$0xff] }
 0x5fe   :  { %2180 = vmatmul.mubr.msk.f32.vlgmr.msra.gmra.mrb[6].mxu1 %vm71_vm0, %v634_v29  ;;  %2373 = vmatprep.subr.bf16.mxu0 %v2372_v27  ;;  %v890_v29 = vld [vmem:[%s3165_s5 + $0x28] sm:$0xff] }
 0x5ff   :  { %2363 = vmatpush3.bf16.msra.mxu1 %v2360_v60  ;;  %2375 = vmatpush3.bf16.msra.mxu0 %v2372_v27 }
 0x600   :  { %2365 = vmatprep.subr.bf16.mxu1 %v2364_v18 }
 0x603   :  { %2367 = vmatpush3.bf16.msra.mxu1 %v2364_v18 }
 0x6d1   :  { %v2181_v36 = vpop.f32.mrb[6].mxu1 }
 0x6d2   :  { %v733_v37 = vadd.f32 %v2181_v36, %v2646_v5  ;;  %v723_v38 = vpop.f32.mrb[7].mxu1  ;;  %v891_v36 = vld [vmem:[%s3165_s5 + $0x30] sm:$0xff] }
 0x6d3   :  { %v732_v39 = vadd.f32 %v723_v38, %v2641_v3 }
 0x6d4   :  { %v2794_v40 = vadd.f32 %v737_v32, %v733_v37  ;;  %v892_v37 = vld [vmem:[%s3165_s5 + $0x38] sm:$0xff] }
 0x6d5   :  { %v2796_v41 = vadd.f32 %v737_v32, %v732_v39  ;;  %v2376_v32 = vpack.c.bf16 %v890_v29, %v889_v28  ;;  %v2380_v38 = vpack.c.bf16 %v892_v37, %v891_v36  ;;  %v893_v39 = vld [vmem:[%s3165_s5 + $0x40] sm:$0xff] }
 0x6d6   :  { %v743_v42 = vsel %vm71_vm0, %v2794_v40, 0.0 }
 0x6d7   :  { %744 = vadd.xlane.f32.xlu1 %v743_v42  ;;  %v740_v43 = vsel %vm71_vm0, %v2796_v41, 0.0  ;;  %2377 = vmatprep.subr.bf16.mxu0 %v2376_v32  ;;  %v894_v42 = vld [vmem:[%s3165_s5 + $0x48] sm:$0xff] }
 0x6d8   :  { %741 = vadd.xlane.f32.xlu0 %v740_v43  ;;  %2379 = vmatpush3.bf16.msra.mxu0 %v2376_v32  ;;  %v895_v43 = vld [vmem:[%s3165_s5 + $0x50] sm:$0xff] }
 0x6d9   :  { %2381 = vmatprep.subr.bf16.mxu0 %v2380_v38 }
 0x6dc   :  { %2383 = vmatpush3.bf16.msra.mxu0 %v2380_v38 }
 0x764   :  { %v745_v44 = vpop.xlane.xlu1 %744 }
 0x765   :  { %v747_v45 = vmul.f32 0.03125, %v745_v44  ;;  %v742_v47 = vpop.xlane.xlu0 %741  ;;  %v2384_v44 = vpack.c.bf16 %v894_v42, %v893_v39 }
 0x766   :  { %v746_v48 = vmul.f32 0.03125, %v742_v47 }
 0x767   :  { %v749_v5 = vsub.f32 %v2794_v40, %v747_v45  ;;  %v896_v45 = vld [vmem:[%s3165_s5 + $0x58] sm:$0xff]  ;;  %2385 = vmatprep.subr.bf16.mxu0 %v2384_v44 }
 0x768   :  { %v748_v3 = vsub.f32 %v2796_v41, %v746_v48  ;;  %v2388_v47 = vpack.c.bf16 %v896_v45, %v895_v43  ;;  %v897_v48 = vld [vmem:[%s3165_s5 + $0x60] sm:$0xff]  ;;  %2387 = vmatpush3.bf16.msra.mxu0 %v2384_v44 }
 0x769   :  { %v751_v55 = vmul.f32 %v749_v5, %v749_v5 }
 0x76a   :  { %v750_v50 = vmul.f32 %v748_v3, %v748_v3  ;;  %2389 = vmatprep.subr.bf16.mxu0 %v2388_v47 }
 0x76b   :  { %v755_v58 = vsel %vm71_vm0, %v751_v55, 0.0 }
 0x76c   :  { %v752_v52 = vsel %vm71_vm0, %v750_v50, 0.0  ;;  %v899_v50 = vld [vmem:[%s3165_s5 + $0x70] sm:$0xff]  ;;  %2391 = vmatpush3.bf16.msra.mxu0 %v2388_v47 }
 0x76d   :  { %753 = vadd.xlane.f32.xlu0 %v752_v52  ;;  %v900_v52 = vld [vmem:[%s3165_s5 + $0x78] sm:$0xff] }
 0x76e   :  { %v2396_v55 = vpack.c.bf16 %v900_v52, %v899_v50  ;;  %v2913_v50 = vld [vmem:[%s3162_s3 + $0x30] sm:$0xff]  ;;  %v2918_v52 = vld [vmem:[%s3162_s3 + $0x38] sm:$0xff] }
 0x771   :  { %756 = vadd.xlane.f32.xlu0 %v755_v58  ;;  %v784_v58 = vsub.s32 7, %v2682_v31 }
 0x773   :  { %v785_v53 = vrot.slane %v2690_v34, %v784_v58 }
 0x7fa   :  { %v754_v23 = vpop.xlane.xlu0 %753 }
 0x7fb   :  { %v758_v63 = vmul.f32 0.03125, %v754_v23 }
 0x7fd   :  { %v760_v0 = vadd.f32 1e-05, %v758_v63 }
 0x7fe   :  { %v757_v1 = vpop.xlane.xlu0 %756 }
 0x7ff   :  { %2544 = vrsqrt.f32 %v760_v0  ;;  %v759_v2 = vmul.f32 0.03125, %v757_v1 }
 0x801   :  { %v761_v4 = vadd.f32 1e-05, %v759_v2 }
 0x803   :  { %2546 = vrsqrt.f32 %v761_v4 }
 0x809   :  { %v2545_v11 = vpop.eup %2544 }
 0x80a   :  { %v764_v12 = vmul.f32 %v2545_v11, %v748_v3 }
 0x80c   :  { %v770_v14 = vmul.f32 %v769_v10, %v764_v12 }
 0x80d   :  { %v2547_v15 = vpop.eup %2546 }
 0x80e   :  { %v765_v16 = vmul.f32 %v2547_v15, %v749_v5  ;;  %v776_v17 = vadd.f32 %v775_v13, %v770_v14  ;;  %v898_v5 = vld [vmem:[%s3165_s5 + $0x68] sm:$0xff] }
 0x80f   :  { %v2392_v3 = vpack.c.bf16 %v898_v5, %v897_v48  ;;  %v2901_v48 = vld [vmem:[%s3162_s3 + $0x20] sm:$0xff]  ;;  %v2906_v5 = vld [vmem:[%s3162_s3 + $0x28] sm:$0xff] }
 0x810   :  { %v771_v22 = vmul.f32 %v769_v10, %v765_v16  ;;  %2190 = vmatprep.mubr.msk.f32.mxu1 %vm71_vm0, %v776_v17 }
 0x811   :  { %2393 = vmatprep.subr.bf16.mxu0 %v2392_v3 }
 0x812   :  { %v777_v24 = vadd.f32 %v775_v13, %v771_v22  ;;  %2395 = vmatpush3.bf16.msra.mxu0 %v2392_v3  ;;  %v980_v22 = vsub.s32 5, %v2682_v31  ;;  %v2400_v3 = vpack.c.bf16 %v2906_v5, %v2901_v48 }
 0x813   :  { %2397 = vmatprep.subr.bf16.mxu0 %v2396_v55 }
 0x814   :  { %2191 = vmatmul.mubr.msk.f32.vlgmr.msra.gmra.mrb[8].mxu1 %vm71_vm0, %v777_v24  ;;  %v981_v24 = vrot.slane %v2690_v34, %v980_v22  ;;  %2401 = vmatprep.subr.bf16.mxu1 %v2400_v3 }
 0x815   :  { %2403 = vmatpush3.bf16.msra.mxu1 %v2400_v3 }
 0x816   :  { %2399 = vmatpush3.bf16.msra.mxu0 %v2396_v55  ;;  %v2404_v55 = vpack.c.bf16 %v2918_v52, %v2913_v50 }
 0x818   :  { %2405 = vmatprep.subr.bf16.mxu1 %v2404_v55 }
 0x819   :  { %2407 = vmatpush3.bf16.msra.mxu1 %v2404_v55 }
 0x8e7   :  { %v2192_v59 = vpop.f32.mrb[8].mxu1 }
 0x8e8   :  { %v864_v60 = vadd.f32 %v2192_v59, %v785_v53  ;;  %v858_v61 = vpop.f32.mrb[9].mxu1 }
 0x8e9   :  { %v859_v62 = vadd.f32 %v858_v61, %v785_v53 }
 0x8ea   :  { %v870_v18 = vmul.f32 0.044715, %v864_v60  ;;  %v868_v15 = vmul.f32 0.5, %v864_v60 }
 0x8eb   :  { %v869_v19 = vmul.f32 0.044715, %v859_v62  ;;  %v867_v13 = vmul.f32 0.5, %v859_v62 }
 0x8ec   :  { %v872_v20 = vmul.f32 %v870_v18, %v864_v60 }
 0x8ed   :  { %v871_v21 = vmul.f32 %v869_v19, %v859_v62  ;;  %v2925_v19 = vld [vmem:[%s3163_s2 + $0x8] sm:$0xff] }
 0x8ee   :  { %v874_v23 = vmul.f32 %v872_v20, %v864_v60  ;;  %v1020_v20 = vrot.slane %v2925_v19, %v2685_v33 }
 0x8ef   :  { %v873_v63 = vmul.f32 %v871_v21, %v859_v62 }
 0x8f0   :  { %v876_v0 = vadd.f32 %v874_v23, %v864_v60 }
 0x8f1   :  { %v875_v1 = vadd.f32 %v873_v63, %v859_v62 }
 0x8f2   :  { %v878_v2 = vmul.f32 0.7978846, %v876_v0 }
 0x8f3   :  { %v877_v4 = vmul.f32 0.7978846, %v875_v1  ;;  %v1026_v1 = vrot.slane %v2925_v19, %v2693_v35 }
 0x8f4   :  { %2548 = vtanh.f32 %v878_v2 }
 0x8f5   :  { %2550 = vtanh.f32 %v877_v4 }
 0x8fe   :  { %v2549_v10 = vpop.eup %2548 }
 0x8ff   :  { %v2551_v11 = vpop.eup %2550  ;;  %v882_v12 = vadd.f32 1.0, %v2549_v10 }
 0x900   :  { %v881_v14 = vadd.f32 1.0, %v2551_v11 }
 0x901   :  { %v884_v17 = vmul.f32 %v882_v12, %v868_v15  ;;  %v1032_v12 = vrot.slane %v2925_v19, %v113_v46 }
 0x902   :  { %v883_v16 = vmul.f32 %v881_v14, %v867_v13 }
 0x904   :  { %2225 = vmatprep.mubr.f32.mxu0 %v883_v16 }
 0x905   :  { %2226 = vmatmul.mubr.f32.vlgmr.msra.gmra.mrb[4].mxu0 %v884_v17 }
 0x9d8   :  { %v2227_v25 = vpop.f32.mrb[4].mxu0 }
 0x9d9   :  { %v977_v26 = vadd.f32 %v2227_v25, %v2794_v40  ;;  %v967_v27 = vpop.f32.mrb[5].mxu0 }
 0x9da   :  { %v976_v28 = vadd.f32 %v967_v27, %v2796_v41 }
 0x9db   :  { %v2886_v29 = vadd.f32 %v981_v24, %v977_v26 }
 0x9dc   :  { %v2888_v32 = vadd.f32 %v981_v24, %v976_v28 }
 0x9dd   :  { %v994_v36 = vsel %vm71_vm0, %v2886_v29, 0.0 }
 0x9de   :  { %995 = vadd.xlane.f32.xlu1 %v994_v36  ;;  %v991_v37 = vsel %vm71_vm0, %v2888_v32, 0.0 }
 0x9df   :  { %992 = vadd.xlane.f32.xlu0 %v991_v37 }
 0xa6b   :  { %v996_v38 = vpop.xlane.xlu1 %995 }
 0xa6c   :  { %v998_v34 = vmul.f32 0.03125, %v996_v38  ;;  %v993_v39 = vpop.xlane.xlu0 %992 }
 0xa6d   :  { %v997_v42 = vmul.f32 0.03125, %v993_v39 }
 0xa6e   :  { %v1000_v40 = vsub.f32 %v2886_v29, %v998_v34 }
 0xa6f   :  { %v999_v41 = vsub.f32 %v2888_v32, %v997_v42 }
 0xa70   :  { %v1002_v43 = vmul.f32 %v1000_v40, %v1000_v40 }
 0xa71   :  { %v1001_v44 = vmul.f32 %v999_v41, %v999_v41 }
 0xa72   :  { %v1006_v45 = vsel %vm71_vm0, %v1002_v43, 0.0 }
 0xa73   :  { %1007 = vadd.xlane.f32.xlu1 %v1006_v45  ;;  %v1003_v47 = vsel %vm71_vm0, %v1001_v44, 0.0 }
 0xa74   :  { %1004 = vadd.xlane.f32.xlu0 %v1003_v47 }
 0xb00   :  { %v1008_v53 = vpop.xlane.xlu1 %1007 }
 0xb01   :  { %v1010_v59 = vmul.f32 0.03125, %v1008_v53  ;;  %v1005_v60 = vpop.xlane.xlu0 %1004 }
 0xb02   :  { %v1009_v61 = vmul.f32 0.03125, %v1005_v60 }
 0xb03   :  { %v1012_v62 = vadd.f32 1e-05, %v1010_v59 }
 0xb04   :  { %v1011_v18 = vadd.f32 1e-05, %v1009_v61 }
 0xb05   :  { %2552 = vrsqrt.f32 %v1012_v62 }
 0xb06   :  { %2554 = vrsqrt.f32 %v1011_v18 }
 0xb0f   :  { %v2553_v21 = vpop.eup %2552 }
 0xb10   :  { %v2555_v23 = vpop.eup %2554  ;;  %v1016_v63 = vmul.f32 %v2553_v21, %v1000_v40 }
 0xb11   :  { %v1015_v0 = vmul.f32 %v2555_v23, %v999_v41 }
 0xb12   :  { %v1022_v2 = vmul.f32 %v1020_v20, %v1016_v63 }
 0xb13   :  { %v1021_v4 = vmul.f32 %v1020_v20, %v1015_v0 }
 0xb14   :  { %v1028_v11 = vadd.f32 %v1026_v1, %v1022_v2 }
 0xb15   :  { %v1027_v10 = vadd.f32 %v1026_v1, %v1021_v4 }
 0xb17   :  { %2236 = vmatprep.mubr.msk.f32.mxu1 %vm71_vm0, %v1027_v10 }
 0xb18   :  { %2237 = vmatmul.mubr.msk.f32.vlgmr.msra.gmra.mrb[10].mxu1 %vm71_vm0, %v1028_v11 }
 0xbeb   :  { %v2238_v13 = vpop.f32.mrb[10].mxu1 }
 0xbec   :  { %v2936_v14 = vadd.f32 %v2238_v13, %v1032_v12  ;;  %v1105_v15 = vpop.f32.mrb[11].mxu1 }
 0xbed   :  { %v2938_v16 = vadd.f32 %v1105_v15, %v1032_v12 }
 0xbee   :  { %1147 = vrot.lane.b32.xlu1 %v2936_v14, %s2584_s17  ;;  %v1115_v26 = vmul.f32 0.25, %v2936_v14 }
 0xbef   :  { %1117 = vrot.lane.b32.xlu0 %v2938_v16, %s2584_s17  ;;  %v1114_v17 = vmul.f32 0.25, %v2938_v16  ;;  %v2504_v53 = vpack.i.bf16 %v2936_v14, %v2938_v16 }
 0xbf1   :  { %2243 = vmatprep.mubr.msk.f32.mxu1 %vm233_vm1, %v1114_v17 }
 0xc60   :  { %v1148_v24 = vpop.permute.xlu1 %1147 }
 0xc61   :  { %v2946_v25 = vpop.permute.xlu0 %1117 }
 0xc62   :  { %v2408_v46 = vpack.c.bf16 %v1148_v24, %v2946_v25 }
 0xc64   :  { %2410 = vmatprep.subr.msk.bf16.mxu1 %vm2728_vm2, %v2408_v46 }
 0xc65   :  { %2413 = vmatpush3.bf16.xpose.msk.msra.mxu1 %vm2728_vm2, %v2408_v46 }
 0xc6c   :  { %2244 = vmatmul.mubr.msk.f32.vlgmr.msra.gmra.mrb[12].mxu1 %vm233_vm1, %v1115_v26 }
 0xd3f   :  { %v2245_v27 = vpop.f32.mrb[12].mxu1 }
 0xd40   :  { %v1231_v28 = vadd.f32 %v2245_v27, %v2746_v6  ;;  %v1225_v36 = vpop.f32.mrb[13].mxu1 }
 0xd41   :  { %v1226_v37 = vadd.f32 %v1225_v36, %v2748_v7 }
 0xd42   :  { %v1237_v38 = vsel %vm233_vm1, %v1231_v28, -inf }
 0xd43   :  { %1238 = vmax.xlane.f32.xlu0 %v1237_v38  ;;  %v1234_v34 = vsel %vm233_vm1, %v1226_v37, -inf }
 0xd44   :  { %1235 = vmax.xlane.f32.xlu1 %v1234_v34 }
 0xdd0   :  { %v1239_v39 = vpop.xlane.xlu0 %1238 }
 0xdd1   :  { %v1241_v42 = vsub.f32 %v1231_v28, %v1239_v39  ;;  %v1236_v40 = vpop.xlane.xlu1 %1235 }
 0xdd2   :  { %v1240_v41 = vsub.f32 %v1226_v37, %v1236_v40 }
 0xdd3   :  { %v1244_v43 = vmul.f32 1.442695, %v1241_v42 }
 0xdd4   :  { %v1242_v44 = vmul.f32 1.442695, %v1240_v41 }
 0xdd5   :  { %2556 = vpow2.f32 %v1244_v43 }
 0xdd6   :  { %2558 = vpow2.f32 %v1242_v44 }
 0xddf   :  { %v2557_v45 = vpop.eup %2556 }
 0xde0   :  { %v2559_v47 = vpop.eup %2558  ;;  %v1249_v3 = vsel %vm233_vm1, %v2557_v45, 0.0 }
 0xde1   :  { %1250 = vadd.xlane.f32.xlu1 %v1249_v3  ;;  %v1246_v55 = vsel %vm233_vm1, %v2559_v47, 0.0 }
 0xde2   :  { %1247 = vadd.xlane.f32.xlu0 %v1246_v55 }
 0xdf2   :  { %1256 = vrot.lane.b32.xlu1 %v2936_v14, %s2588_s20 }
 0xdf6   :  { %2505 = vrot.lane.b32.xlu1 %v2504_v53, %s2585_s18 }
 0xdf8   :  { %1134 = vrot.lane.b32.xlu0 %v2938_v16, %s2588_s20 }
 0xdfa   :  { %1340 = vrot.lane.b32.xlu1 %v1114_v17, %s2586_s19 }
 0xdfc   :  { %1342 = vrot.lane.b32.xlu0 %v1115_v26, %s2586_s19 }
 0xe6e   :  { %v1251_v59 = vpop.xlane.xlu1 %1250 }
 0xe6f   :  { %2560 = vrcp.f32 %v1251_v59  ;;  %v1248_v60 = vpop.xlane.xlu0 %1247 }
 0xe70   :  { %2562 = vrcp.f32 %v1248_v60 }
 0xe72   :  { %v1257_v61 = vpop.permute.xlu1 %1256 }
 0xe73   :  { %v2970_v62 = vpop.permute.xlu0 %1134 }
 0xe74   :  { %v2414_v18 = vpack.c.bf16 %v1257_v61, %v2970_v62 }
 0xe76   :  { %2415 = vmatprep.subr.bf16.mxu1 %v2414_v18  ;;  %v2506_v20 = vpop.permute.xlu1 %2505 }
 0xe77   :  { %v2508_v21 = vunpack.i.h.bf16 %v2506_v20  ;;  %v2507_v23 = vunpack.i.l.bf16 %v2506_v20  ;;  %2417 = vmatpush3.bf16.msra.mxu1 %v2414_v18  ;;  %v1343_v11 = vpop.permute.xlu0 %1342 }
 0xe79   :  { %v2561_v63 = vpop.eup %2560  ;;  %v2418_v0 = vpack.c.bf16 %v2508_v21, %v2507_v23 }
 0xe7a   :  { %v2563_v1 = vpop.eup %2562  ;;  %v1255_v4 = vmul.f32 %v2561_v63, %v2557_v45  ;;  %v1341_v10 = vpop.permute.xlu1 %1340  ;;  %v2514_v45 = vpack.i.bf16 %v2906_v5, %v2901_v48 }
 0xe7b   :  { %2420 = vmatprep.subr.msk.bf16.mxu1 %vm2728_vm2, %v2418_v0  ;;  %v1254_v2 = vmul.f32 %v2563_v1, %v2559_v47  ;;  %v2519_v47 = vpack.i.bf16 %v2918_v52, %v2913_v50 }
 0xe7d   :  { %2250 = vmatprep.mubr.msk.f32.mxu1 %vm233_vm1, %v1254_v2 }
 0xe7e   :  { %2251 = vmatmul.mubr.msk.f32.vlgmr.msra.gmra.mrb[14].mxu1 %vm233_vm1, %v1255_v4 }
 0xe7f   :  { %2257 = vmatprep.mubr.msk.f32.mxu1 %vm233_vm1, %v1341_v10 }
 0xe80   :  { %2423 = vmatpush3.bf16.xpose.msk.msra.mxu1 %vm2728_vm2, %v2418_v0 }
 0xe87   :  { %2258 = vmatmul.mubr.msk.f32.vlgmr.msra.gmra.mrb[16].mxu1 %vm233_vm1, %v1343_v11  ;;  %v1652_v11 = vrot.slane %v2925_v19, %v736_v30 }
 0xf51   :  { %v2981_v12 = vpop.f32.mrb[14].mxu1 }
 0xf52   :  { %v1331_v13 = vpop.f32.mrb[15].mxu1 }
 0xf5a   :  { %v2259_v15 = vpop.f32.mrb[16].mxu1 }
 0xf5b   :  { %v1428_v17 = vadd.f32 %v2259_v15, %v2746_v6  ;;  %v1422_v24 = vpop.f32.mrb[17].mxu1 }
 0xf5c   :  { %v1423_v46 = vadd.f32 %v1422_v24, %v2748_v7 }
 0xf5d   :  { %v1434_v26 = vsel %vm233_vm1, %v1428_v17, -inf }
 0xf5e   :  { %1435 = vmax.xlane.f32.xlu0 %v1434_v26  ;;  %v1431_v27 = vsel %vm233_vm1, %v1423_v46, -inf }
 0xf5f   :  { %1432 = vmax.xlane.f32.xlu1 %v1431_v27 }
 0xf70   :  { %2510 = vrot.lane.b32.xlu1 %v2504_v53, %s2589_s21 }
 0xf74   :  { %2520 = vrot.lane.b32.xlu1 %v2519_v47, %s2590_s22 }
 0xfeb   :  { %v1436_v57 = vpop.xlane.xlu0 %1435 }
 0xfec   :  { %v1438_v28 = vsub.f32 %v1428_v17, %v1436_v57  ;;  %v1433_v36 = vpop.xlane.xlu1 %1432 }
 0xfed   :  { %v1437_v37 = vsub.f32 %v1423_v46, %v1433_v36 }
 0xfee   :  { %v1441_v38 = vmul.f32 1.442695, %v1438_v28 }
 0xfef   :  { %v1439_v34 = vmul.f32 1.442695, %v1437_v37 }
 0xff0   :  { %v2511_v39 = vpop.permute.xlu1 %2510 }
 0xff1   :  { %2564 = vpow2.f32 %v1439_v34  ;;  %v2513_v6 = vunpack.i.h.bf16 %v2511_v39  ;;  %v2512_v42 = vunpack.i.l.bf16 %v2511_v39 }
 0xff2   :  { %2566 = vpow2.f32 %v1441_v38 }
 0xff3   :  { %v2424_v7 = vpack.c.bf16 %v2513_v6, %v2512_v42  ;;  %v2005_v6 = vld [vmem:[%s3164_s4 + $0x20] sm:$0xff]  ;;  %v2006_v42 = vld [vmem:[%s3164_s4 + $0x28] sm:$0xff] }
 0xff4   :  { %v2521_v5 = vpop.permute.xlu1 %2520 }
 0xff5   :  { %2425 = vmatprep.subr.bf16.mxu1 %v2424_v7  ;;  %v2523_v52 = vunpack.i.h.bf16 %v2521_v5  ;;  %v2522_v20 = vunpack.i.l.bf16 %v2521_v5 }
 0xff6   :  { %2427 = vmatpush3.bf16.msra.mxu1 %v2424_v7  ;;  %v2436_v7 = vpack.c.bf16 %v2006_v42, %v2005_v6 }
 0xff7   :  { %v2432_v23 = vpack.c.bf16 %v2523_v52, %v2522_v20 }
 0xff8   :  { %2437 = vmatprep.subr.bf16.mxu1 %v2436_v7 }
 0xffb   :  { %v2565_v40 = vpop.eup %2564 }
 0xffc   :  { %v1443_v41 = vsel %vm233_vm1, %v2565_v40, 0.0  ;;  %v2567_v43 = vpop.eup %2566 }
 0xffd   :  { %1444 = vadd.xlane.f32.xlu0 %v1443_v41  ;;  %v1446_v44 = vsel %vm233_vm1, %v2567_v43, 0.0  ;;  %v2008_v41 = vld [vmem:[%s3164_s4 + $0x38] sm:$0xff] }
0x1001   :  { %1447 = vadd.xlane.f32.xlu0 %v1446_v44  ;;  %v2011_v44 = vld [vmem:[%s3165_s5 + $0x80] sm:$0xff] }
0x1017   :  { %2515 = vrot.lane.b32.xlu0 %v2514_v45, %s2590_s22  ;;  %v2012_v45 = vld [vmem:[%s3165_s5 + $0x88] sm:$0xff] }
0x1018   :  { %v2444_v47 = vpack.c.bf16 %v2012_v45, %v2011_v44 }
0x108a   :  { %v1445_v3 = vpop.xlane.xlu0 %1444 }
0x108b   :  { %2568 = vrcp.f32 %v1445_v3 }
0x108e   :  { %v1448_v55 = vpop.xlane.xlu0 %1447 }
0x108f   :  { %2570 = vrcp.f32 %v1448_v55 }
0x1092   :  { %v2516_v48 = vpop.permute.xlu0 %2515 }
0x1093   :  { %v2518_v18 = vunpack.i.h.bf16 %v2516_v48  ;;  %v2517_v50 = vunpack.i.l.bf16 %v2516_v48  ;;  %v1684_v48 = vrot.slane %v2925_v19, %v768_v8  ;;  %v2013_v8 = vld [vmem:[%s3165_s5 + $0x90] sm:$0xff] }
0x1095   :  { %v2569_v53 = vpop.eup %2568  ;;  %v2428_v21 = vpack.c.bf16 %v2518_v18, %v2517_v50  ;;  %v1690_v50 = vrot.slane %v2925_v19, %v774_v9  ;;  %v2015_v9 = vld [vmem:[%s3165_s5 + $0xa0] sm:$0xff] }
0x1096   :  { %v1451_v59 = vmul.f32 %v2569_v53, %v2565_v40  ;;  %v2007_v40 = vld [vmem:[%s3164_s4 + $0x30] sm:$0xff] }
0x1097   :  { %2429 = vmatprep.subr.bf16.mxu0 %v2428_v21 }
0x1098   :  { %2264 = vmatprep.mubr.msk.f32.mxu1 %vm233_vm1, %v1451_v59  ;;  %2431 = vmatpush3.bf16.msra.mxu0 %v2428_v21 }
0x1099   :  { %v2571_v60 = vpop.eup %2570  ;;  %2433 = vmatprep.subr.bf16.mxu0 %v2432_v23 }
0x109a   :  { %v1452_v61 = vmul.f32 %v2571_v60, %v2567_v43  ;;  %v2440_v43 = vpack.c.bf16 %v2008_v41, %v2007_v40 }
0x109c   :  { %2265 = vmatmul.mubr.msk.f32.vlgmr.msra.gmra.mrb[18].mxu1 %vm233_vm1, %v1452_v61  ;;  %2435 = vmatpush3.bf16.msra.mxu0 %v2432_v23 }
0x109d   :  { %2439 = vmatpush3.bf16.msra.mxu1 %v2436_v7  ;;  %2445 = vmatprep.subr.bf16.mxu0 %v2444_v47 }
0x109e   :  { %2441 = vmatprep.subr.bf16.mxu1 %v2440_v43 }
0x10a1   :  { %2443 = vmatpush3.bf16.msra.mxu1 %v2440_v43 }
0x116f   :  { %v2266_v63 = vpop.f32.mrb[18].mxu1 }
0x1170   :  { %v1531_v0 = vpop.f32.mrb[19].mxu1 }
0x1171   :  { %1542 = vrot.lane.b32.xlu1 %v1531_v0, %s2591_s23 }
0x1175   :  { %1544 = vrot.lane.b32.xlu1 %v2266_v63, %s2591_s23 }
0x11e3   :  { %v1543_v1 = vpop.permute.xlu1 %1542 }
0x11e4   :  { %v1548_v2 = vsel %vm233_vm1, %v1331_v13, %v1543_v1  ;;  %v2014_v1 = vld [vmem:[%s3165_s5 + $0x98] sm:$0xff] }
0x11e5   :  { %2275 = vmatprep.mubr.msk.f32.mxu0 %vm71_vm0, %v1548_v2  ;;  %v2448_v2 = vpack.c.bf16 %v2014_v1, %v2013_v8 }
0x11e7   :  { %v1545_v4 = vpop.permute.xlu1 %1544 }
0x11e8   :  { %v1549_v10 = vsel %vm233_vm1, %v2981_v12, %v1545_v4  ;;  %v2016_v4 = vld [vmem:[%s3165_s5 + $0xa8] sm:$0xff] }
0x11e9   :  { %2276 = vmatmul.mubr.msk.f32.vlgmr.msra.gmra.mrb[6].mxu0 %vm71_vm0, %v1549_v10  ;;  %v2452_v10 = vpack.c.bf16 %v2016_v4, %v2015_v9 }
0x11ea   :  { %2447 = vmatpush3.bf16.msra.mxu0 %v2444_v47 }
0x11eb   :  { %2449 = vmatprep.subr.bf16.mxu0 %v2448_v2 }
0x11ee   :  { %2451 = vmatpush3.bf16.msra.mxu0 %v2448_v2 }
0x11ef   :  { %2453 = vmatprep.subr.bf16.mxu0 %v2452_v10 }
0x11f2   :  { %2455 = vmatpush3.bf16.msra.mxu0 %v2452_v10 }
0x12bc   :  { %v2277_v15 = vpop.f32.mrb[6].mxu0 }
0x12bd   :  { %v1648_v17 = vadd.f32 %v2277_v15, %v2886_v29  ;;  %v1638_v24 = vpop.f32.mrb[7].mxu0  ;;  %v2018_v15 = vld [vmem:[%s3165_s5 + $0xb8] sm:$0xff] }
0x12be   :  { %v1647_v46 = vadd.f32 %v1638_v24, %v2888_v32  ;;  %v2019_v24 = vld [vmem:[%s3165_s5 + $0xc0] sm:$0xff] }
0x12bf   :  { %v3010_v26 = vadd.f32 %v1652_v11, %v1648_v17 }
0x12c0   :  { %v3012_v13 = vadd.f32 %v1652_v11, %v1647_v46  ;;  %v2017_v11 = vld [vmem:[%s3165_s5 + $0xb0] sm:$0xff]  ;;  %v2020_v46 = vld [vmem:[%s3165_s5 + $0xc8] sm:$0xff] }
0x12c1   :  { %v1658_v27 = vsel %vm71_vm0, %v3010_v26, 0.0  ;;  %v2456_v17 = vpack.c.bf16 %v2018_v15, %v2017_v11 }
0x12c2   :  { %1659 = vadd.xlane.f32.xlu1 %v1658_v27  ;;  %v1655_v12 = vsel %vm71_vm0, %v3012_v13, 0.0  ;;  %v2021_v27 = vld [vmem:[%s3165_s5 + $0xd0] sm:$0xff] }
0x12c3   :  { %1656 = vadd.xlane.f32.xlu0 %v1655_v12  ;;  %2457 = vmatprep.subr.bf16.mxu0 %v2456_v17  ;;  %v2460_v12 = vpack.c.bf16 %v2020_v46, %v2019_v24  ;;  %v1120_v24 = vrot.slane %v2938_v16, 4  ;;  %v202_v46 = vrot.slane %v2707_v51, 4  ;;  %v1126_v16 = vrot.slane %v2936_v14, 4 }
0x12c4   :  { %2459 = vmatpush3.bf16.msra.mxu0 %v2456_v17 }
0x12c5   :  { %2461 = vmatprep.subr.bf16.mxu0 %v2460_v12 }
0x12c8   :  { %2463 = vmatpush3.bf16.msra.mxu0 %v2460_v12 }
0x134f   :  { %v1660_v57 = vpop.xlane.xlu1 %1659 }
0x1350   :  { %v1662_v30 = vmul.f32 0.03125, %v1660_v57  ;;  %v1657_v28 = vpop.xlane.xlu0 %1656  ;;  %v2022_v57 = vld [vmem:[%s3165_s5 + $0xd8] sm:$0xff] }
0x1351   :  { %v1661_v36 = vmul.f32 0.03125, %v1657_v28  ;;  %v2023_v28 = vld [vmem:[%s3165_s5 + $0xe0] sm:$0xff] }
0x1352   :  { %v1664_v29 = vsub.f32 %v3010_v26, %v1662_v30  ;;  %v2464_v30 = vpack.c.bf16 %v2022_v57, %v2021_v27  ;;  %v208_v27 = vrot.slane %v2705_v49, 4 }
0x1353   :  { %v1663_v32 = vsub.f32 %v3012_v13, %v1661_v36  ;;  %v2024_v36 = vld [vmem:[%s3165_s5 + $0xe8] sm:$0xff] }
0x1354   :  { %v1666_v34 = vmul.f32 %v1664_v29, %v1664_v29  ;;  %2465 = vmatprep.subr.bf16.mxu0 %v2464_v30 }
0x1355   :  { %v1665_v37 = vmul.f32 %v1663_v32, %v1663_v32  ;;  %2467 = vmatpush3.bf16.msra.mxu0 %v2464_v30 }
0x1356   :  { %v1670_v39 = vsel %vm71_vm0, %v1666_v34, 0.0  ;;  %v1701_v34 = vrot.slane %v2925_v19, %v784_v58 }
0x1357   :  { %v1667_v38 = vsel %vm71_vm0, %v1665_v37, 0.0  ;;  %v2026_v37 = vld [vmem:[%s3165_s5 + $0xf8] sm:$0xff] }
0x1358   :  { %1668 = vadd.xlane.f32.xlu0 %v1667_v38 }
0x135c   :  { %1671 = vadd.xlane.f32.xlu0 %v1670_v39 }
0x13e5   :  { %v1669_v3 = vpop.xlane.xlu0 %1668 }
0x13e6   :  { %v1673_v55 = vmul.f32 0.03125, %v1669_v3 }
0x13e8   :  { %v1675_v53 = vadd.f32 1e-05, %v1673_v55 }
0x13e9   :  { %v1672_v59 = vpop.xlane.xlu0 %1671 }
0x13ea   :  { %2572 = vrsqrt.f32 %v1675_v53  ;;  %v1674_v60 = vmul.f32 0.03125, %v1672_v59 }
0x13ec   :  { %v1676_v61 = vadd.f32 1e-05, %v1674_v60 }
0x13ee   :  { %2574 = vrsqrt.f32 %v1676_v61 }
0x13f4   :  { %v2573_v5 = vpop.eup %2572 }
0x13f5   :  { %v1679_v18 = vmul.f32 %v2573_v5, %v1663_v32  ;;  %v2025_v32 = vld [vmem:[%s3165_s5 + $0xf0] sm:$0xff] }
0x13f6   :  { %v2472_v38 = vpack.c.bf16 %v2026_v37, %v2025_v32 }
0x13f7   :  { %v1685_v52 = vmul.f32 %v1684_v48, %v1679_v18 }
0x13f8   :  { %v2575_v20 = vpop.eup %2574 }
0x13f9   :  { %v1680_v21 = vmul.f32 %v2575_v20, %v1664_v29  ;;  %v1691_v23 = vadd.f32 %v1690_v50, %v1685_v52  ;;  %v2468_v29 = vpack.c.bf16 %v2024_v36, %v2023_v28  ;;  %v1898_v20 = vrot.slane %v2925_v19, %v980_v22 }
0x13fb   :  { %v1686_v63 = vmul.f32 %v1684_v48, %v1680_v21  ;;  %2286 = vmatprep.mubr.msk.f32.mxu1 %vm71_vm0, %v1691_v23  ;;  %2469 = vmatprep.subr.bf16.mxu0 %v2468_v29 }
0x13fc   :  { %2471 = vmatpush3.bf16.msra.mxu0 %v2468_v29 }
0x13fd   :  { %v1692_v0 = vadd.f32 %v1690_v50, %v1686_v63  ;;  %2473 = vmatprep.subr.bf16.mxu0 %v2472_v38 }
0x13ff   :  { %2287 = vmatmul.mubr.msk.f32.vlgmr.msra.gmra.mrb[20].mxu1 %vm71_vm0, %v1692_v0 }
0x1400   :  { %2475 = vmatpush3.bf16.msra.mxu0 %v2472_v38 }
0x14d2   :  { %v2288_v39 = vpop.f32.mrb[20].mxu1 }
0x14d3   :  { %v1780_v6 = vadd.f32 %v2288_v39, %v1701_v34  ;;  %v1774_v42 = vpop.f32.mrb[21].mxu1  ;;  %v2027_v39 = vld [vmem:[%s3163_s2 + $0x10] sm:$0xff] }
0x14d4   :  { %v1775_v7 = vadd.f32 %v1774_v42, %v1701_v34 }
0x14d5   :  { %v1786_v40 = vmul.f32 0.044715, %v1780_v6  ;;  %v1784_v18 = vmul.f32 0.5, %v1780_v6 }
0x14d6   :  { %v1785_v41 = vmul.f32 0.044715, %v1775_v7  ;;  %v1783_v58 = vmul.f32 0.5, %v1775_v7 }
0x14d7   :  { %v1788_v43 = vmul.f32 %v1786_v40, %v1780_v6 }
0x14d8   :  { %v1787_v44 = vmul.f32 %v1785_v41, %v1775_v7 }
0x14d9   :  { %v1790_v45 = vmul.f32 %v1788_v43, %v1780_v6 }
0x14da   :  { %v1789_v47 = vmul.f32 %v1787_v44, %v1775_v7  ;;  %v1932_v44 = vrot.slane %v2027_v39, %v2685_v33 }
0x14db   :  { %v1792_v3 = vadd.f32 %v1790_v45, %v1780_v6  ;;  %v212_v6 = vsel %vm71_vm0, %v2724_v56, %v202_v46 }
0x14dc   :  { %v1791_v55 = vadd.f32 %v1789_v47, %v1775_v7 }
0x14dd   :  { %v1794_v53 = vmul.f32 0.7978846, %v1792_v3  ;;  %v1938_v3 = vrot.slane %v2027_v39, %v2693_v35 }
0x14de   :  { %v1793_v59 = vmul.f32 0.7978846, %v1791_v55 }
0x14df   :  { %2576 = vtanh.f32 %v1794_v53 }
0x14e0   :  { %2578 = vtanh.f32 %v1793_v59 }
0x14e9   :  { %v2577_v60 = vpop.eup %2576 }
0x14ea   :  { %v2579_v61 = vpop.eup %2578  ;;  %v1798_v48 = vadd.f32 1.0, %v2577_v60 }
0x14eb   :  { %v1797_v5 = vadd.f32 1.0, %v2579_v61 }
0x14ec   :  { %v1800_v52 = vmul.f32 %v1798_v48, %v1784_v18 }
0x14ed   :  { %v1799_v50 = vmul.f32 %v1797_v5, %v1783_v58 }
0x14ef   :  { %2321 = vmatprep.mubr.f32.mxu0 %v1799_v50 }
0x14f0   :  { %2322 = vmatmul.mubr.f32.vlgmr.msra.gmra.mrb[8].mxu0 %v1800_v52 }
0x15c3   :  { %v2323_v21 = vpop.f32.mrb[8].mxu0 }
0x15c4   :  { %v1894_v23 = vadd.f32 %v2323_v21, %v3010_v26  ;;  %v1884_v63 = vpop.f32.mrb[9].mxu0 }
0x15c5   :  { %v1893_v0 = vadd.f32 %v1884_v63, %v3012_v13 }
0x15c6   :  { %v1900_v8 = vadd.f32 %v1898_v20, %v1894_v23 }
0x15c7   :  { %v1899_v1 = vadd.f32 %v1898_v20, %v1893_v0 }
0x15c8   :  { %v1906_v2 = vsel %vm71_vm0, %v1900_v8, 0.0 }
0x15c9   :  { %1907 = vadd.xlane.f32.xlu1 %v1906_v2  ;;  %v1903_v9 = vsel %vm71_vm0, %v1899_v1, 0.0 }
0x15ca   :  { %1904 = vadd.xlane.f32.xlu0 %v1903_v9 }
0x1656   :  { %v1908_v4 = vpop.xlane.xlu1 %1907 }
0x1657   :  { %v1910_v10 = vmul.f32 0.03125, %v1908_v4  ;;  %v1905_v11 = vpop.xlane.xlu0 %1904 }
0x1658   :  { %v1909_v31 = vmul.f32 0.03125, %v1905_v11 }
0x1659   :  { %v1912_v15 = vsub.f32 %v1900_v8, %v1910_v10 }
0x165a   :  { %v1911_v22 = vsub.f32 %v1899_v1, %v1909_v31 }
0x165b   :  { %v1914_v19 = vmul.f32 %v1912_v15, %v1912_v15 }
0x165c   :  { %v1913_v17 = vmul.f32 %v1911_v22, %v1911_v22 }
0x165d   :  { %v1918_v26 = vsel %vm71_vm0, %v1914_v19, 0.0 }
0x165e   :  { %1919 = vadd.xlane.f32.xlu1 %v1918_v26  ;;  %v1915_v13 = vsel %vm71_vm0, %v1913_v17, 0.0 }
0x165f   :  { %1916 = vadd.xlane.f32.xlu0 %v1915_v13 }
0x166f   :  { %1137 = vrot.lane.b32.xlu1 %v1120_v24, %s2584_s17 }
0x1673   :  { %205 = vrot.lane.b32.xlu1 %v2705_v49, %s2590_s22 }
0x1675   :  { %221 = vrot.lane.b32.xlu0 %v202_v46, %s2584_s17 }
0x1677   :  { %224 = vrot.lane.b32.xlu1 %v208_v27, %s2590_s22 }
0x1679   :  { %1123 = vrot.lane.b32.xlu0 %v2936_v14, %s2590_s22 }
0x167d   :  { %209 = vrot.lane.b32.xlu0 %v208_v27, %s2588_s20 }
0x1681   :  { %1127 = vrot.lane.b32.xlu0 %v1126_v16, %s2588_s20 }
0x16eb   :  { %v1920_v12 = vpop.xlane.xlu1 %1919 }
0x16ec   :  { %v1922_v51 = vmul.f32 0.03125, %v1920_v12  ;;  %v1917_v57 = vpop.xlane.xlu0 %1916 }
0x16ed   :  { %v1921_v30 = vmul.f32 0.03125, %v1917_v57 }
0x16ee   :  { %v1924_v28 = vadd.f32 1e-05, %v1922_v51 }
0x16ef   :  { %v1923_v36 = vadd.f32 1e-05, %v1921_v30  ;;  %v1138_v29 = vpop.permute.xlu1 %1137 }
0x16f0   :  { %2580 = vrsqrt.f32 %v1924_v28  ;;  %v222_v32 = vpop.permute.xlu0 %221  ;;  %v1143_v50 = vsel %vm71_vm0, %v2970_v62, %v1138_v29 }
0x16f1   :  { %2582 = vrsqrt.f32 %v1923_v36  ;;  %v227_v38 = vsel %vm71_vm0, %v2775_v54, %v222_v32  ;;  %v1144_v63 = vsel %vm213_vm11, %v1143_v50, %v2936_v14 }
0x16f2   :  { %v228_v7 = vsel %vm213_vm11, %v227_v38, %v2705_v49  ;;  %v1130_v49 = vsel %vm71_vm0, %v2946_v25, %v1120_v24 }
0x16f3   :  { %v206_v37 = vpop.permute.xlu1 %205 }
0x16f4   :  { %v1124_v34 = vpop.permute.xlu0 %1123  ;;  %v214_v40 = vsel %vm213_vm11, %v212_v6, %v206_v37 }
0x16f5   :  { %v1131_v55 = vsel %vm213_vm11, %v1130_v49, %v1124_v34 }
0x16f7   :  { %v225_v42 = vpop.permute.xlu1 %224 }
0x16f8   :  { %v229_v41 = vsel %vm215_vm12, %v228_v7, %v225_v42  ;;  %v210_v43 = vpop.permute.xlu0 %209 }
0x16f9   :  { %230 = vst [vmem:[%s3166_s7 + $0x4] sm:$0xf] %v229_v41  ;;  %v216_v54 = vsel %vm215_vm12, %v214_v40, %v210_v43 }
0x16fa   :  { %v2581_v45 = vpop.eup %2580  ;;  %217 = vst [vmem:[%s3166_s7] sm:$0xf] %v216_v54 }
0x16fb   :  { %v2583_v56 = vpop.eup %2582  ;;  %v1928_v47 = vmul.f32 %v2581_v45, %v1912_v15 }
0x16fc   :  { %v1128_v53 = vpop.permute.xlu0 %1127  ;;  %v1927_v59 = vmul.f32 %v2583_v56, %v1911_v22 }
0x16fd   :  { %v1132_v60 = vsel %vm215_vm12, %v1131_v55, %v1128_v53  ;;  %v1934_v61 = vmul.f32 %v1932_v44, %v1928_v47 }
0x16fe   :  { %1133 = vst [vmem:[%s3166_s7 + $0x8] sm:$0xf] %v1132_v60  ;;  %v1933_v33 = vmul.f32 %v1932_v44, %v1927_v59 }
0x16ff   :  { %v1940_v48 = vadd.f32 %v1938_v3, %v1934_v61 }
0x1700   :  { %v1939_v58 = vadd.f32 %v1938_v3, %v1933_v33 }
0x1701   :  { %1947 = vrot.lane.b32.xlu1 %v1940_v48, %s2588_s20  ;;  %v1950_v25 = vrot.slane %v1940_v48, 4 }
0x1702   :  { %v1942_v5 = vrot.slane %v1939_v58, 4 }
0x1703   :  { %1951 = vrot.lane.b32.xlu0 %v1950_v25, %s2584_s17 }
0x1705   :  { %1943 = vrot.lane.b32.xlu1 %v1942_v5, %s2590_s22 }
0x1709   :  { %1140 = vrot.lane.b32.xlu1 %v1126_v16, %s2590_s22 }
0x1773   :  { %v1948_v35 = vpop.permute.xlu1 %1947 }
0x1775   :  { %v1952_v20 = vpop.permute.xlu0 %1951 }
0x1777   :  { %v1944_v18 = vpop.permute.xlu1 %1943 }
0x1778   :  { %v1954_v52 = vsel %vm71_vm0, %v1939_v58, %v1944_v18 }
0x1779   :  { %v1955_v21 = vsel %vm213_vm11, %v1954_v52, %v1948_v35 }
0x177a   :  { %v1956_v23 = vsel %vm215_vm12, %v1955_v21, %v1952_v20 }
0x177b   :  { %1957 = vst [vmem:[%s3167_s6] sm:$0xf] %v1956_v23  ;;  %v1141_v0 = vpop.permute.xlu1 %1140 }
0x177c   :  { %v1145_v8 = vsel %vm215_vm12, %v1144_v63, %v1141_v0 }
0x177d   :  { %1146 = vst [vmem:[%s3166_s7 + $0xc] sm:$0xf] %v1145_v8 }

</bundles_post_ra>
